<compile_context>
chip_gen: v7x
topology: tpu7x:2x2x1
jax: 0.10.0
libtpu: 0.0.40
codegen_flags: <defaults>
</compile_context>

<pallas_src>
import functools

import jax
import jax.numpy as jnp
from jax import lax
from jax.experimental import pallas as pl
from jax.experimental.pallas import tpu as pltpu

EPS = 1e-5

_VMEM = pl.BlockSpec(memory_space=pltpu.MemorySpace.VMEM)


# ------------------------------ fused kernel --------------------------------

def _deconv_block_kernel(x_ref, w1_ref, b1_ref, w2_ref, b2_ref, g_ref, bt_ref,
                         mask_ref, o_ref, buf1_ref, buf2_ref, patch_ref, y_ref,
                         *, h, w, matmul_dtype=None):
    # x_ref   : (N, Cin, H*W)            NCHW input, spatial flattened (free)
    # w*_ref  : (Cout, 9*C)              conv-form weights, tap-major K
    # b*_ref  : (Cout, 1)                conv biases
    # g/bt    : (Cout, 1)                shared BatchNorm gamma / beta
    # mask_ref: (2, H*W)                 column-validity masks (kw=0 / kw=2)
    # o_ref   : (N, Cout, H*W)           lane-dense output (reshaped to NCHW
    #                                    outside at zero cost)
    # buf*_ref: (C, (H+2)*W + 2)         zero-padded flat halo buffers
    # patch_ref: (9*Cmax, H*W)           im2col staging buffer
    # y_ref   : (N, Cout, H*W)           VMEM-resident activations
    n_im, _, hw = x_ref.shape
    cout = o_ref.shape[1]
    inv_cnt = 1.0 / float(n_im * hw)

    # Zero the halo buffers once: only the interior rows are rewritten per
    # image, the padding rows / sentinel lanes stay zero.
    buf1_ref[...] = jnp.zeros_like(buf1_ref)
    buf2_ref[...] = jnp.zeros_like(buf2_ref)

    w1 = w1_ref[...]
    w2 = w2_ref[...]
    b1 = b1_ref[...]
    b2 = b2_ref[...]
    gamma = g_ref[...]
    beta = bt_ref[...]
    m_left = mask_ref[0:1, :]     # zero where col == 0      (kw = 0 taps)
    m_right = mask_ref[1:2, :]    # zero where col == W - 1  (kw = 2 taps)

    def conv3x3(buf_ref, wmat):
        """3x3 'same' conv of the image held in buf_ref -> (Cout, H*W) f32."""
        c = buf_ref.shape[0]
        # Build the im2col matrix: tap t = kh*3+kw is a static lane-shifted
        # slice of the flat zero-padded image (masked at the W boundaries).
        for kh in range(3):
            for kw in range(3):
                t = buf_ref[:, kh * w + kw: kh * w + kw + hw]
                if kw == 0:
                    t = t * m_left
                elif kw == 2:
                    t = t * m_right
                tap = kh * 3 + kw
                patch_ref[tap * c:(tap + 1) * c, :] = t
        lhs = wmat                                  # (Cout, 9*C)
        rhs = patch_ref[0:9 * c, :]                 # (9*C, H*W)
        if matmul_dtype is not None:                # optional bf16 MXU path
            lhs = lhs.astype(matmul_dtype)
            rhs = rhs.astype(matmul_dtype)
        return jnp.dot(lhs, rhs, preferred_element_type=jnp.float32)

    # ---- pass 1: conv1 + bias + ReLU; single-pass BN1 statistics -----------
    s1 = jnp.zeros((cout, 1), jnp.float32)
    q1 = jnp.zeros((cout, 1), jnp.float32)
    for i in range(n_im):
        buf1_ref[:, 1 + w:1 + (h + 1) * w] = x_ref[i].astype(jnp.float32)
        y = jnp.maximum(conv3x3(buf1_ref, w1) + b1, 0.0)      # (Cout, H*W)
        y_ref[i] = y
        s1 = s1 + jnp.sum(y, axis=1, keepdims=True)
        q1 = q1 + jnp.sum(y * y, axis=1, keepdims=True)
    mean1 = s1 * inv_cnt
    var1 = q1 * inv_cnt - mean1 * mean1
    scale1 = gamma * lax.rsqrt(var1 + EPS)
    shift1 = beta - mean1 * scale1

    # ---- pass 2: BN1-normalize + conv2 + bias + ReLU; BN2 statistics -------
    s2 = jnp.zeros((cout, 1), jnp.float32)
    q2 = jnp.zeros((cout, 1), jnp.float32)
    for i in range(n_im):
        z = y_ref[i] * scale1 + shift1                        # (Cout, H*W)
        buf2_ref[:, 1 + w:1 + (h + 1) * w] = z
        y = jnp.maximum(conv3x3(buf2_ref, w2) + b2, 0.0)
        y_ref[i] = y                                          # scratch reuse
        s2 = s2 + jnp.sum(y, axis=1, keepdims=True)
        q2 = q2 + jnp.sum(y * y, axis=1, keepdims=True)
    mean2 = s2 * inv_cnt
    var2 = q2 * inv_cnt - mean2 * mean2
    scale2 = gamma * lax.rsqrt(var2 + EPS)
    shift2 = beta - mean2 * scale2

    # ---- pass 3: BN2-normalize, lane-dense store (256 lanes wide) ----------
    for i in range(n_im):
        o_ref[i] = (y_ref[i] * scale2 + shift2).astype(o_ref.dtype)


# -------------------------------- wrapper ------------------------------------

def _deconv_weight_to_matmul(w_deconv):
    """ConvTranspose2d weight (Cin, Cout, 3, 3) -> matmul form (Cout, 9*Cin).

    ConvTranspose2d(k=3, s=1, p=1) equals a 3x3 'same' convolution with the
    spatially flipped kernel and in/out channels swapped.  Rows are ordered
    (kh*3 + kw)*Cin + ci to match the kernel's im2col tap order.
    """
    wc = jnp.flip(w_deconv, axis=(2, 3)).transpose(1, 0, 2, 3)   # (Cout,Cin,3,3)
    cout = wc.shape[0]
    return wc.transpose(0, 2, 3, 1).reshape(cout, -1)            # (Cout, 9*Cin)


def deconv_block_forward(x_nchw, params, *, matmul_dtype=None):
    """Fused DeConvBlock forward.  Input/output layout: NCHW (PyTorch)."""
    n, cin, h, w = x_nchw.shape
    cout = params["b1"].shape[0]
    hw = h * w
    cmax = max(cin, cout)

    # Column-validity masks for the left / right 3x3 taps (built once, tiny).
    col = jnp.arange(hw, dtype=jnp.int32) % w
    masks = jnp.stack([(col != 0), (col != w - 1)]).astype(jnp.float32)

    kernel = functools.partial(_deconv_block_kernel, h=h, w=w,
                               matmul_dtype=matmul_dtype)

    out_flat = pl.pallas_call(
        kernel,
        out_shape=jax.ShapeDtypeStruct((n, cout, hw), x_nchw.dtype),
        in_specs=[_VMEM] * 8,
        out_specs=_VMEM,
        scratch_shapes=[
            pltpu.VMEM((cin, (h + 2) * w + 2), jnp.float32),   # conv1 halo buf
            pltpu.VMEM((cout, (h + 2) * w + 2), jnp.float32),  # conv2 halo buf
            pltpu.VMEM((9 * cmax, hw), jnp.float32),           # im2col staging
            pltpu.VMEM((n, cout, hw), jnp.float32),            # resident acts
        ],
        compiler_params=pltpu.CompilerParams(
            vmem_limit_bytes=32 * 1024 * 1024),
    )(
        x_nchw.reshape(n, cin, hw),            # free reshape, no transpose/pad
        _deconv_weight_to_matmul(params["w1"]),
        params["b1"].reshape(cout, 1),
        _deconv_weight_to_matmul(params["w2"]),
        params["b2"].reshape(cout, 1),
        params["gamma"].reshape(cout, 1),
        params["beta"].reshape(cout, 1),
        masks,
    )
    return out_flat.reshape(n, cout, h, w)     # free reshape back to NCHW


# --------------------------- pure-JAX reference -------------------------------

def reference_forward(x, w1, b1, w2, b2, gamma, beta):
    def convT(x, wt, b):
        wc = jnp.flip(wt, axis=(2, 3)).transpose(1, 0, 2, 3)   # (Cout,Cin,3,3)
        y = lax.conv_general_dilated(
            x, wc, (1, 1), "SAME",
            dimension_numbers=("NCHW", "OIHW", "NCHW"))
        return y + b.reshape(1, -1, 1, 1)

    def bn(x):
        mean = jnp.mean(x, axis=(0, 2, 3), keepdims=True)
        var = jnp.mean((x - mean) ** 2, axis=(0, 2, 3), keepdims=True)
        return ((x - mean) * lax.rsqrt(var + EPS)
                * gamma.reshape(1, -1, 1, 1) + beta.reshape(1, -1, 1, 1))

    x = jax.nn.relu(convT(x, w1, b1)); x = bn(x)
    x = jax.nn.relu(convT(x, w2, b2)); x = bn(x)
    return x


# ----------------------------------- main -------------------------------------

if __name__ == "__main__":
    N, Cin, Cout, H, W = 2, 4, 8, 16, 16

    key = jax.random.PRNGKey(0)
    kx, kw1, kb1, kw2, kb2, kg, kbt = jax.random.split(key, 7)

    x = jax.random.normal(kx, (N, Cin, H, W), dtype=jnp.float32)

    # Deterministic synthetic parameters (shapes match the nn.Module).
    w1 = 0.1 * jax.random.normal(kw1, (Cin, Cout, 3, 3), dtype=jnp.float32)
    b1 = 0.1 * jax.random.normal(kb1, (Cout,), dtype=jnp.float32)
    w2 = 0.1 * jax.random.normal(kw2, (Cout, Cout, 3, 3), dtype=jnp.float32)
    b2 = 0.1 * jax.random.normal(kb2, (Cout,), dtype=jnp.float32)
    gamma = 1.0 + 0.1 * jax.random.normal(kg, (Cout,), dtype=jnp.float32)
    beta = 0.1 * jax.random.normal(kbt, (Cout,), dtype=jnp.float32)

    params = dict(w1=w1, b1=b1, w2=w2, b2=b2, gamma=gamma, beta=beta)

    out = jax.jit(deconv_block_forward)(x, params)
    out = jax.block_until_ready(out)

    ref = reference_forward(x, w1, b1, w2, b2, gamma, beta)
    assert out.shape == (N, Cout, H, W)
    max_err = float(jnp.max(jnp.abs(out - ref)))
    assert jnp.allclose(out, ref, rtol=2e-2, atol=2e-2), max_err

    print("KERNEL_OK")
</pallas_src>

<mosaic_0001>
module attributes {stable_mosaic.version = 11 : i64} {
  func.func @_deconv_block_kernel(%arg0: memref<2x4x256xf32, #tpu.memory_space<vmem>>, %arg1: memref<8x36xf32, #tpu.memory_space<vmem>>, %arg2: memref<8x1xf32, #tpu.memory_space<vmem>>, %arg3: memref<8x72xf32, #tpu.memory_space<vmem>>, %arg4: memref<8x1xf32, #tpu.memory_space<vmem>>, %arg5: memref<8x1xf32, #tpu.memory_space<vmem>>, %arg6: memref<8x1xf32, #tpu.memory_space<vmem>>, %arg7: memref<2x256xf32, #tpu.memory_space<vmem>>, %arg8: memref<2x8x256xf32, #tpu.memory_space<vmem>>, %arg9: memref<4x290xf32, #tpu.memory_space<vmem>>, %arg10: memref<8x290xf32, #tpu.memory_space<vmem>>, %arg11: memref<72x256xf32, #tpu.memory_space<vmem>>, %arg12: memref<2x8x256xf32, #tpu.memory_space<vmem>>) attributes {dimension_semantics = [], scalar_prefetch = 0 : i64, scratch_operands = 4 : i64, tpu.core_type = #tpu.core_type<tc>} {
    %cst = arith.constant 0.000000e+00 : f32
    %0 = vector.broadcast %cst : f32 to vector<4x290xf32>
    %c0 = arith.constant 0 : index
    %c0_0 = arith.constant 0 : index
    %1 = vector.load %arg9[%c0, %c0_0] : memref<4x290xf32, #tpu.memory_space<vmem>>, vector<4x290xf32>
    tpu.vector_store %arg9[%c0, %c0_0], %0 {strides = array<i32>} : memref<4x290xf32, #tpu.memory_space<vmem>>, vector<4x290xf32>,
    %cst_1 = arith.constant 0.000000e+00 : f32
    %2 = vector.broadcast %cst_1 : f32 to vector<8x290xf32>
    %c0_2 = arith.constant 0 : index
    %c0_3 = arith.constant 0 : index
    %3 = vector.load %arg10[%c0_2, %c0_3] : memref<8x290xf32, #tpu.memory_space<vmem>>, vector<8x290xf32>
    tpu.vector_store %arg10[%c0_2, %c0_3], %2 {strides = array<i32>} : memref<8x290xf32, #tpu.memory_space<vmem>>, vector<8x290xf32>,
    %c0_4 = arith.constant 0 : index
    %c0_5 = arith.constant 0 : index
    %4 = vector.load %arg1[%c0_4, %c0_5] : memref<8x36xf32, #tpu.memory_space<vmem>>, vector<8x36xf32>
    %c0_6 = arith.constant 0 : index
    %c0_7 = arith.constant 0 : index
    %5 = vector.load %arg3[%c0_6, %c0_7] : memref<8x72xf32, #tpu.memory_space<vmem>>, vector<8x72xf32>
    %c0_8 = arith.constant 0 : index
    %c0_9 = arith.constant 0 : index
    %6 = vector.load %arg2[%c0_8, %c0_9] : memref<8x1xf32, #tpu.memory_space<vmem>>, vector<8x1xf32>
    %c0_10 = arith.constant 0 : index
    %c0_11 = arith.constant 0 : index
    %7 = vector.load %arg4[%c0_10, %c0_11] : memref<8x1xf32, #tpu.memory_space<vmem>>, vector<8x1xf32>
    %c0_12 = arith.constant 0 : index
    %c0_13 = arith.constant 0 : index
    %8 = vector.load %arg5[%c0_12, %c0_13] : memref<8x1xf32, #tpu.memory_space<vmem>>, vector<8x1xf32>
    %c0_14 = arith.constant 0 : index
    %c0_15 = arith.constant 0 : index
    %9 = vector.load %arg6[%c0_14, %c0_15] : memref<8x1xf32, #tpu.memory_space<vmem>>, vector<8x1xf32>
    %c0_16 = arith.constant 0 : index
    %c0_17 = arith.constant 0 : index
    %10 = vector.load %arg7[%c0_16, %c0_17] : memref<2x256xf32, #tpu.memory_space<vmem>>, vector<1x256xf32>
    %c1 = arith.constant 1 : index
    %c0_18 = arith.constant 0 : index
    %11 = vector.load %arg7[%c1, %c0_18] : memref<2x256xf32, #tpu.memory_space<vmem>>, vector<1x256xf32>
    %cst_19 = arith.constant 0.000000e+00 : f32
    %12 = vector.broadcast %cst_19 : f32 to vector<8x1xf32>
    %cst_20 = arith.constant 0.000000e+00 : f32
    %13 = vector.broadcast %cst_20 : f32 to vector<8x1xf32>
    %c0_21 = arith.constant 0 : index
    %c0_22 = arith.constant 0 : index
    %c0_23 = arith.constant 0 : index
    %14 = vector.load %arg0[%c0_21, %c0_22, %c0_23] : memref<2x4x256xf32, #tpu.memory_space<vmem>>, vector<1x4x256xf32>
    %15 = vector.shape_cast %14 : vector<1x4x256xf32> to vector<4x256xf32>
    %c0_24 = arith.constant 0 : index
    %c17 = arith.constant 17 : index
    %16 = vector.load %arg9[%c0_24, %c17] : memref<4x290xf32, #tpu.memory_space<vmem>>, vector<4x256xf32>
    tpu.vector_store %arg9[%c0_24, %c17], %15 {strides = array<i32>} : memref<4x290xf32, #tpu.memory_space<vmem>>, vector<4x256xf32>,
    %c0_25 = arith.constant 0 : index
    %c0_26 = arith.constant 0 : index
    %17 = vector.load %arg9[%c0_25, %c0_26] : memref<4x290xf32, #tpu.memory_space<vmem>>, vector<4x256xf32>
    %18 = vector.broadcast %10 : vector<1x256xf32> to vector<4x256xf32>
    %19 = arith.mulf %17, %18 : vector<4x256xf32>
    %c0_27 = arith.constant 0 : index
    %c0_28 = arith.constant 0 : index
    %20 = vector.load %arg11[%c0_27, %c0_28] : memref<72x256xf32, #tpu.memory_space<vmem>>, vector<4x256xf32>
    tpu.vector_store %arg11[%c0_27, %c0_28], %19 {strides = array<i32>} : memref<72x256xf32, #tpu.memory_space<vmem>>, vector<4x256xf32>,
    %c0_29 = arith.constant 0 : index
    %c1_30 = arith.constant 1 : index
    %21 = vector.load %arg9[%c0_29, %c1_30] : memref<4x290xf32, #tpu.memory_space<vmem>>, vector<4x256xf32>
    %c4 = arith.constant 4 : index
    %c0_31 = arith.constant 0 : index
    %22 = vector.load %arg11[%c4, %c0_31] : memref<72x256xf32, #tpu.memory_space<vmem>>, vector<4x256xf32>
    tpu.vector_store %arg11[%c4, %c0_31], %21 {strides = array<i32>} : memref<72x256xf32, #tpu.memory_space<vmem>>, vector<4x256xf32>,
    %c0_32 = arith.constant 0 : index
    %c2 = arith.constant 2 : index
    %23 = vector.load %arg9[%c0_32, %c2] : memref<4x290xf32, #tpu.memory_space<vmem>>, vector<4x256xf32>
    %24 = vector.broadcast %11 : vector<1x256xf32> to vector<4x256xf32>
    %25 = arith.mulf %23, %24 : vector<4x256xf32>
    %c8 = arith.constant 8 : index
    %c0_33 = arith.constant 0 : index
    %26 = vector.load %arg11[%c8, %c0_33] : memref<72x256xf32, #tpu.memory_space<vmem>>, vector<4x256xf32>
    tpu.vector_store %arg11[%c8, %c0_33], %25 {strides = array<i32>} : memref<72x256xf32, #tpu.memory_space<vmem>>, vector<4x256xf32>,
    %c0_34 = arith.constant 0 : index
    %c16 = arith.constant 16 : index
    %27 = vector.load %arg9[%c0_34, %c16] : memref<4x290xf32, #tpu.memory_space<vmem>>, vector<4x256xf32>
    %28 = vector.broadcast %10 : vector<1x256xf32> to vector<4x256xf32>
    %29 = arith.mulf %27, %28 : vector<4x256xf32>
    %c12 = arith.constant 12 : index
    %c0_35 = arith.constant 0 : index
    %30 = vector.load %arg11[%c12, %c0_35] : memref<72x256xf32, #tpu.memory_space<vmem>>, vector<4x256xf32>
    tpu.vector_store %arg11[%c12, %c0_35], %29 {strides = array<i32>} : memref<72x256xf32, #tpu.memory_space<vmem>>, vector<4x256xf32>,
    %c0_36 = arith.constant 0 : index
    %c17_37 = arith.constant 17 : index
    %31 = vector.load %arg9[%c0_36, %c17_37] : memref<4x290xf32, #tpu.memory_space<vmem>>, vector<4x256xf32>
    %c16_38 = arith.constant 16 : index
    %c0_39 = arith.constant 0 : index
    %32 = vector.load %arg11[%c16_38, %c0_39] : memref<72x256xf32, #tpu.memory_space<vmem>>, vector<4x256xf32>
    tpu.vector_store %arg11[%c16_38, %c0_39], %31 {strides = array<i32>} : memref<72x256xf32, #tpu.memory_space<vmem>>, vector<4x256xf32>,
    %c0_40 = arith.constant 0 : index
    %c18 = arith.constant 18 : index
    %33 = vector.load %arg9[%c0_40, %c18] : memref<4x290xf32, #tpu.memory_space<vmem>>, vector<4x256xf32>
    %34 = vector.broadcast %11 : vector<1x256xf32> to vector<4x256xf32>
    %35 = arith.mulf %33, %34 : vector<4x256xf32>
    %c20 = arith.constant 20 : index
    %c0_41 = arith.constant 0 : index
    %36 = vector.load %arg11[%c20, %c0_41] : memref<72x256xf32, #tpu.memory_space<vmem>>, vector<4x256xf32>
    tpu.vector_store %arg11[%c20, %c0_41], %35 {strides = array<i32>} : memref<72x256xf32, #tpu.memory_space<vmem>>, vector<4x256xf32>,
    %c0_42 = arith.constant 0 : index
    %c32 = arith.constant 32 : index
    %37 = vector.load %arg9[%c0_42, %c32] : memref<4x290xf32, #tpu.memory_space<vmem>>, vector<4x256xf32>
    %38 = vector.broadcast %10 : vector<1x256xf32> to vector<4x256xf32>
    %39 = arith.mulf %37, %38 : vector<4x256xf32>
    %c24 = arith.constant 24 : index
    %c0_43 = arith.constant 0 : index
    %40 = vector.load %arg11[%c24, %c0_43] : memref<72x256xf32, #tpu.memory_space<vmem>>, vector<4x256xf32>
    tpu.vector_store %arg11[%c24, %c0_43], %39 {strides = array<i32>} : memref<72x256xf32, #tpu.memory_space<vmem>>, vector<4x256xf32>,
    %c0_44 = arith.constant 0 : index
    %c33 = arith.constant 33 : index
    %41 = vector.load %arg9[%c0_44, %c33] : memref<4x290xf32, #tpu.memory_space<vmem>>, vector<4x256xf32>
    %c28 = arith.constant 28 : index
    %c0_45 = arith.constant 0 : index
    %42 = vector.load %arg11[%c28, %c0_45] : memref<72x256xf32, #tpu.memory_space<vmem>>, vector<4x256xf32>
    tpu.vector_store %arg11[%c28, %c0_45], %41 {strides = array<i32>} : memref<72x256xf32, #tpu.memory_space<vmem>>, vector<4x256xf32>,
    %c0_46 = arith.constant 0 : index
    %c34 = arith.constant 34 : index
    %43 = vector.load %arg9[%c0_46, %c34] : memref<4x290xf32, #tpu.memory_space<vmem>>, vector<4x256xf32>
    %44 = vector.broadcast %11 : vector<1x256xf32> to vector<4x256xf32>
    %45 = arith.mulf %43, %44 : vector<4x256xf32>
    %c32_47 = arith.constant 32 : index
    %c0_48 = arith.constant 0 : index
    %46 = vector.load %arg11[%c32_47, %c0_48] : memref<72x256xf32, #tpu.memory_space<vmem>>, vector<4x256xf32>
    tpu.vector_store %arg11[%c32_47, %c0_48], %45 {strides = array<i32>} : memref<72x256xf32, #tpu.memory_space<vmem>>, vector<4x256xf32>,
    %c0_49 = arith.constant 0 : index
    %c0_50 = arith.constant 0 : index
    %47 = vector.load %arg11[%c0_49, %c0_50] : memref<72x256xf32, #tpu.memory_space<vmem>>, vector<36x256xf32>
    %cst_51 = arith.constant dense<0.000000e+00> : vector<8x256xf32>
    %48 = tpu.matmul %4, %47, %cst_51 {dimension_numbers = #tpu.dot_dimension_numbers<[1], [0], [0], [1], [0, 0, 1, 1], [], []>} : vector<8x36xf32>, vector<36x256xf32>, vector<8x256xf32> -> vector<8x256xf32>
    %49 = vector.broadcast %6 : vector<8x1xf32> to vector<8x256xf32>
    %50 = arith.addf %48, %49 : vector<8x256xf32>
    %cst_52 = arith.constant 0.000000e+00 : f32
    %51 = vector.broadcast %cst_52 : f32 to vector<8x256xf32>
    %52 = arith.maximumf %50, %51 : vector<8x256xf32>
    %c0_53 = arith.constant 0 : index
    %c0_54 = arith.constant 0 : index
    %c0_55 = arith.constant 0 : index
    %53 = vector.load %arg12[%c0_53, %c0_54, %c0_55] : memref<2x8x256xf32, #tpu.memory_space<vmem>>, vector<1x8x256xf32>
    %54 = vector.shape_cast %53 : vector<1x8x256xf32> to vector<8x256xf32>
    %55 = vector.shape_cast %52 : vector<8x256xf32> to vector<1x8x256xf32>
    tpu.vector_store %arg12[%c0_53, %c0_54, %c0_55], %55 {strides = array<i32>} : memref<2x8x256xf32, #tpu.memory_space<vmem>>, vector<1x8x256xf32>,
    %cst_56 = arith.constant dense<0.000000e+00> : vector<8xf32>
    %56 = vector.multi_reduction <add>, %52, %cst_56 [1] : vector<8x256xf32> to vector<8xf32>
    %57 = vector.shape_cast %56 : vector<8xf32> to vector<8x1xf32>
    %58 = arith.addf %12, %57 : vector<8x1xf32>
    %59 = arith.mulf %52, %52 : vector<8x256xf32>
    %cst_57 = arith.constant dense<0.000000e+00> : vector<8xf32>
    %60 = vector.multi_reduction <add>, %59, %cst_57 [1] : vector<8x256xf32> to vector<8xf32>
    %61 = vector.shape_cast %60 : vector<8xf32> to vector<8x1xf32>
    %62 = arith.addf %13, %61 : vector<8x1xf32>
    %c1_58 = arith.constant 1 : index
    %c0_59 = arith.constant 0 : index
    %c0_60 = arith.constant 0 : index
    %63 = vector.load %arg0[%c1_58, %c0_59, %c0_60] : memref<2x4x256xf32, #tpu.memory_space<vmem>>, vector<1x4x256xf32>
    %64 = vector.shape_cast %63 : vector<1x4x256xf32> to vector<4x256xf32>
    %c0_61 = arith.constant 0 : index
    %c17_62 = arith.constant 17 : index
    %65 = vector.load %arg9[%c0_61, %c17_62] : memref<4x290xf32, #tpu.memory_space<vmem>>, vector<4x256xf32>
    tpu.vector_store %arg9[%c0_61, %c17_62], %64 {strides = array<i32>} : memref<4x290xf32, #tpu.memory_space<vmem>>, vector<4x256xf32>,
    %c0_63 = arith.constant 0 : index
    %c0_64 = arith.constant 0 : index
    %66 = vector.load %arg9[%c0_63, %c0_64] : memref<4x290xf32, #tpu.memory_space<vmem>>, vector<4x256xf32>
    %67 = vector.broadcast %10 : vector<1x256xf32> to vector<4x256xf32>
    %68 = arith.mulf %66, %67 : vector<4x256xf32>
    %c0_65 = arith.constant 0 : index
    %c0_66 = arith.constant 0 : index
    %69 = vector.load %arg11[%c0_65, %c0_66] : memref<72x256xf32, #tpu.memory_space<vmem>>, vector<4x256xf32>
    tpu.vector_store %arg11[%c0_65, %c0_66], %68 {strides = array<i32>} : memref<72x256xf32, #tpu.memory_space<vmem>>, vector<4x256xf32>,
    %c0_67 = arith.constant 0 : index
    %c1_68 = arith.constant 1 : index
    %70 = vector.load %arg9[%c0_67, %c1_68] : memref<4x290xf32, #tpu.memory_space<vmem>>, vector<4x256xf32>
    %c4_69 = arith.constant 4 : index
    %c0_70 = arith.constant 0 : index
    %71 = vector.load %arg11[%c4_69, %c0_70] : memref<72x256xf32, #tpu.memory_space<vmem>>, vector<4x256xf32>
    tpu.vector_store %arg11[%c4_69, %c0_70], %70 {strides = array<i32>} : memref<72x256xf32, #tpu.memory_space<vmem>>, vector<4x256xf32>,
    %c0_71 = arith.constant 0 : index
    %c2_72 = arith.constant 2 : index
    %72 = vector.load %arg9[%c0_71, %c2_72] : memref<4x290xf32, #tpu.memory_space<vmem>>, vector<4x256xf32>
    %73 = vector.broadcast %11 : vector<1x256xf32> to vector<4x256xf32>
    %74 = arith.mulf %72, %73 : vector<4x256xf32>
    %c8_73 = arith.constant 8 : index
    %c0_74 = arith.constant 0 : index
    %75 = vector.load %arg11[%c8_73, %c0_74] : memref<72x256xf32, #tpu.memory_space<vmem>>, vector<4x256xf32>
    tpu.vector_store %arg11[%c8_73, %c0_74], %74 {strides = array<i32>} : memref<72x256xf32, #tpu.memory_space<vmem>>, vector<4x256xf32>,
    %c0_75 = arith.constant 0 : index
    %c16_76 = arith.constant 16 : index
    %76 = vector.load %arg9[%c0_75, %c16_76] : memref<4x290xf32, #tpu.memory_space<vmem>>, vector<4x256xf32>
    %77 = vector.broadcast %10 : vector<1x256xf32> to vector<4x256xf32>
    %78 = arith.mulf %76, %77 : vector<4x256xf32>
    %c12_77 = arith.constant 12 : index
    %c0_78 = arith.constant 0 : index
    %79 = vector.load %arg11[%c12_77, %c0_78] : memref<72x256xf32, #tpu.memory_space<vmem>>, vector<4x256xf32>
    tpu.vector_store %arg11[%c12_77, %c0_78], %78 {strides = array<i32>} : memref<72x256xf32, #tpu.memory_space<vmem>>, vector<4x256xf32>,
    %c0_79 = arith.constant 0 : index
    %c17_80 = arith.constant 17 : index
    %80 = vector.load %arg9[%c0_79, %c17_80] : memref<4x290xf32, #tpu.memory_space<vmem>>, vector<4x256xf32>
    %c16_81 = arith.constant 16 : index
    %c0_82 = arith.constant 0 : index
    %81 = vector.load %arg11[%c16_81, %c0_82] : memref<72x256xf32, #tpu.memory_space<vmem>>, vector<4x256xf32>
    tpu.vector_store %arg11[%c16_81, %c0_82], %80 {strides = array<i32>} : memref<72x256xf32, #tpu.memory_space<vmem>>, vector<4x256xf32>,
    %c0_83 = arith.constant 0 : index
    %c18_84 = arith.constant 18 : index
    %82 = vector.load %arg9[%c0_83, %c18_84] : memref<4x290xf32, #tpu.memory_space<vmem>>, vector<4x256xf32>
    %83 = vector.broadcast %11 : vector<1x256xf32> to vector<4x256xf32>
    %84 = arith.mulf %82, %83 : vector<4x256xf32>
    %c20_85 = arith.constant 20 : index
    %c0_86 = arith.constant 0 : index
    %85 = vector.load %arg11[%c20_85, %c0_86] : memref<72x256xf32, #tpu.memory_space<vmem>>, vector<4x256xf32>
    tpu.vector_store %arg11[%c20_85, %c0_86], %84 {strides = array<i32>} : memref<72x256xf32, #tpu.memory_space<vmem>>, vector<4x256xf32>,
    %c0_87 = arith.constant 0 : index
    %c32_88 = arith.constant 32 : index
    %86 = vector.load %arg9[%c0_87, %c32_88] : memref<4x290xf32, #tpu.memory_space<vmem>>, vector<4x256xf32>
    %87 = vector.broadcast %10 : vector<1x256xf32> to vector<4x256xf32>
    %88 = arith.mulf %86, %87 : vector<4x256xf32>
    %c24_89 = arith.constant 24 : index
    %c0_90 = arith.constant 0 : index
    %89 = vector.load %arg11[%c24_89, %c0_90] : memref<72x256xf32, #tpu.memory_space<vmem>>, vector<4x256xf32>
    tpu.vector_store %arg11[%c24_89, %c0_90], %88 {strides = array<i32>} : memref<72x256xf32, #tpu.memory_space<vmem>>, vector<4x256xf32>,
    %c0_91 = arith.constant 0 : index
    %c33_92 = arith.constant 33 : index
    %90 = vector.load %arg9[%c0_91, %c33_92] : memref<4x290xf32, #tpu.memory_space<vmem>>, vector<4x256xf32>
    %c28_93 = arith.constant 28 : index
    %c0_94 = arith.constant 0 : index
    %91 = vector.load %arg11[%c28_93, %c0_94] : memref<72x256xf32, #tpu.memory_space<vmem>>, vector<4x256xf32>
    tpu.vector_store %arg11[%c28_93, %c0_94], %90 {strides = array<i32>} : memref<72x256xf32, #tpu.memory_space<vmem>>, vector<4x256xf32>,
    %c0_95 = arith.constant 0 : index
    %c34_96 = arith.constant 34 : index
    %92 = vector.load %arg9[%c0_95, %c34_96] : memref<4x290xf32, #tpu.memory_space<vmem>>, vector<4x256xf32>
    %93 = vector.broadcast %11 : vector<1x256xf32> to vector<4x256xf32>
    %94 = arith.mulf %92, %93 : vector<4x256xf32>
    %c32_97 = arith.constant 32 : index
    %c0_98 = arith.constant 0 : index
    %95 = vector.load %arg11[%c32_97, %c0_98] : memref<72x256xf32, #tpu.memory_space<vmem>>, vector<4x256xf32>
    tpu.vector_store %arg11[%c32_97, %c0_98], %94 {strides = array<i32>} : memref<72x256xf32, #tpu.memory_space<vmem>>, vector<4x256xf32>,
    %c0_99 = arith.constant 0 : index
    %c0_100 = arith.constant 0 : index
    %96 = vector.load %arg11[%c0_99, %c0_100] : memref<72x256xf32, #tpu.memory_space<vmem>>, vector<36x256xf32>
    %cst_101 = arith.constant dense<0.000000e+00> : vector<8x256xf32>
    %97 = tpu.matmul %4, %96, %cst_101 {dimension_numbers = #tpu.dot_dimension_numbers<[1], [0], [0], [1], [0, 0, 1, 1], [], []>} : vector<8x36xf32>, vector<36x256xf32>, vector<8x256xf32> -> vector<8x256xf32>
    %98 = vector.broadcast %6 : vector<8x1xf32> to vector<8x256xf32>
    %99 = arith.addf %97, %98 : vector<8x256xf32>
    %cst_102 = arith.constant 0.000000e+00 : f32
    %100 = vector.broadcast %cst_102 : f32 to vector<8x256xf32>
    %101 = arith.maximumf %99, %100 : vector<8x256xf32>
    %c1_103 = arith.constant 1 : index
    %c0_104 = arith.constant 0 : index
    %c0_105 = arith.constant 0 : index
    %102 = vector.load %arg12[%c1_103, %c0_104, %c0_105] : memref<2x8x256xf32, #tpu.memory_space<vmem>>, vector<1x8x256xf32>
    %103 = vector.shape_cast %102 : vector<1x8x256xf32> to vector<8x256xf32>
    %104 = vector.shape_cast %101 : vector<8x256xf32> to vector<1x8x256xf32>
    tpu.vector_store %arg12[%c1_103, %c0_104, %c0_105], %104 {strides = array<i32>} : memref<2x8x256xf32, #tpu.memory_space<vmem>>, vector<1x8x256xf32>,
    %cst_106 = arith.constant dense<0.000000e+00> : vector<8xf32>
    %105 = vector.multi_reduction <add>, %101, %cst_106 [1] : vector<8x256xf32> to vector<8xf32>
    %106 = vector.shape_cast %105 : vector<8xf32> to vector<8x1xf32>
    %107 = arith.addf %58, %106 : vector<8x1xf32>
    %108 = arith.mulf %101, %101 : vector<8x256xf32>
    %cst_107 = arith.constant dense<0.000000e+00> : vector<8xf32>
    %109 = vector.multi_reduction <add>, %108, %cst_107 [1] : vector<8x256xf32> to vector<8xf32>
    %110 = vector.shape_cast %109 : vector<8xf32> to vector<8x1xf32>
    %111 = arith.addf %62, %110 : vector<8x1xf32>
    %cst_108 = arith.constant 0.001953125 : f32
    %112 = vector.broadcast %cst_108 : f32 to vector<8x1xf32>
    %113 = arith.mulf %107, %112 : vector<8x1xf32>
    %cst_109 = arith.constant 0.001953125 : f32
    %114 = vector.broadcast %cst_109 : f32 to vector<8x1xf32>
    %115 = arith.mulf %111, %114 : vector<8x1xf32>
    %116 = arith.mulf %113, %113 : vector<8x1xf32>
    %117 = arith.subf %115, %116 : vector<8x1xf32>
    %cst_110 = arith.constant 9.99999974E-6 : f32
    %118 = vector.broadcast %cst_110 : f32 to vector<8x1xf32>
    %119 = arith.addf %117, %118 : vector<8x1xf32>
    %120 = math.rsqrt %119 : vector<8x1xf32>
    %121 = arith.mulf %8, %120 : vector<8x1xf32>
    %122 = arith.mulf %113, %121 : vector<8x1xf32>
    %123 = arith.subf %9, %122 : vector<8x1xf32>
    %cst_111 = arith.constant 0.000000e+00 : f32
    %124 = vector.broadcast %cst_111 : f32 to vector<8x1xf32>
    %cst_112 = arith.constant 0.000000e+00 : f32
    %125 = vector.broadcast %cst_112 : f32 to vector<8x1xf32>
    %c0_113 = arith.constant 0 : index
    %c0_114 = arith.constant 0 : index
    %c0_115 = arith.constant 0 : index
    %126 = vector.load %arg12[%c0_113, %c0_114, %c0_115] : memref<2x8x256xf32, #tpu.memory_space<vmem>>, vector<1x8x256xf32>
    %127 = vector.shape_cast %126 : vector<1x8x256xf32> to vector<8x256xf32>
    %128 = vector.broadcast %121 : vector<8x1xf32> to vector<8x256xf32>
    %129 = arith.mulf %127, %128 : vector<8x256xf32>
    %130 = vector.broadcast %123 : vector<8x1xf32> to vector<8x256xf32>
    %131 = arith.addf %129, %130 : vector<8x256xf32>
    %c0_116 = arith.constant 0 : index
    %c17_117 = arith.constant 17 : index
    %132 = vector.load %arg10[%c0_116, %c17_117] : memref<8x290xf32, #tpu.memory_space<vmem>>, vector<8x256xf32>
    tpu.vector_store %arg10[%c0_116, %c17_117], %131 {strides = array<i32>} : memref<8x290xf32, #tpu.memory_space<vmem>>, vector<8x256xf32>,
    %c0_118 = arith.constant 0 : index
    %c0_119 = arith.constant 0 : index
    %133 = vector.load %arg10[%c0_118, %c0_119] : memref<8x290xf32, #tpu.memory_space<vmem>>, vector<8x256xf32>
    %134 = vector.broadcast %10 : vector<1x256xf32> to vector<8x256xf32>
    %135 = arith.mulf %133, %134 : vector<8x256xf32>
    %c0_120 = arith.constant 0 : index
    %c0_121 = arith.constant 0 : index
    %136 = vector.load %arg11[%c0_120, %c0_121] : memref<72x256xf32, #tpu.memory_space<vmem>>, vector<8x256xf32>
    tpu.vector_store %arg11[%c0_120, %c0_121], %135 {strides = array<i32>} : memref<72x256xf32, #tpu.memory_space<vmem>>, vector<8x256xf32>,
    %c0_122 = arith.constant 0 : index
    %c1_123 = arith.constant 1 : index
    %137 = vector.load %arg10[%c0_122, %c1_123] : memref<8x290xf32, #tpu.memory_space<vmem>>, vector<8x256xf32>
    %c8_124 = arith.constant 8 : index
    %c0_125 = arith.constant 0 : index
    %138 = vector.load %arg11[%c8_124, %c0_125] : memref<72x256xf32, #tpu.memory_space<vmem>>, vector<8x256xf32>
    tpu.vector_store %arg11[%c8_124, %c0_125], %137 {strides = array<i32>} : memref<72x256xf32, #tpu.memory_space<vmem>>, vector<8x256xf32>,
    %c0_126 = arith.constant 0 : index
    %c2_127 = arith.constant 2 : index
    %139 = vector.load %arg10[%c0_126, %c2_127] : memref<8x290xf32, #tpu.memory_space<vmem>>, vector<8x256xf32>
    %140 = vector.broadcast %11 : vector<1x256xf32> to vector<8x256xf32>
    %141 = arith.mulf %139, %140 : vector<8x256xf32>
    %c16_128 = arith.constant 16 : index
    %c0_129 = arith.constant 0 : index
    %142 = vector.load %arg11[%c16_128, %c0_129] : memref<72x256xf32, #tpu.memory_space<vmem>>, vector<8x256xf32>
    tpu.vector_store %arg11[%c16_128, %c0_129], %141 {strides = array<i32>} : memref<72x256xf32, #tpu.memory_space<vmem>>, vector<8x256xf32>,
    %c0_130 = arith.constant 0 : index
    %c16_131 = arith.constant 16 : index
    %143 = vector.load %arg10[%c0_130, %c16_131] : memref<8x290xf32, #tpu.memory_space<vmem>>, vector<8x256xf32>
    %144 = vector.broadcast %10 : vector<1x256xf32> to vector<8x256xf32>
    %145 = arith.mulf %143, %144 : vector<8x256xf32>
    %c24_132 = arith.constant 24 : index
    %c0_133 = arith.constant 0 : index
    %146 = vector.load %arg11[%c24_132, %c0_133] : memref<72x256xf32, #tpu.memory_space<vmem>>, vector<8x256xf32>
    tpu.vector_store %arg11[%c24_132, %c0_133], %145 {strides = array<i32>} : memref<72x256xf32, #tpu.memory_space<vmem>>, vector<8x256xf32>,
    %c0_134 = arith.constant 0 : index
    %c17_135 = arith.constant 17 : index
    %147 = vector.load %arg10[%c0_134, %c17_135] : memref<8x290xf32, #tpu.memory_space<vmem>>, vector<8x256xf32>
    %c32_136 = arith.constant 32 : index
    %c0_137 = arith.constant 0 : index
    %148 = vector.load %arg11[%c32_136, %c0_137] : memref<72x256xf32, #tpu.memory_space<vmem>>, vector<8x256xf32>
    tpu.vector_store %arg11[%c32_136, %c0_137], %147 {strides = array<i32>} : memref<72x256xf32, #tpu.memory_space<vmem>>, vector<8x256xf32>,
    %c0_138 = arith.constant 0 : index
    %c18_139 = arith.constant 18 : index
    %149 = vector.load %arg10[%c0_138, %c18_139] : memref<8x290xf32, #tpu.memory_space<vmem>>, vector<8x256xf32>
    %150 = vector.broadcast %11 : vector<1x256xf32> to vector<8x256xf32>
    %151 = arith.mulf %149, %150 : vector<8x256xf32>
    %c40 = arith.constant 40 : index
    %c0_140 = arith.constant 0 : index
    %152 = vector.load %arg11[%c40, %c0_140] : memref<72x256xf32, #tpu.memory_space<vmem>>, vector<8x256xf32>
    tpu.vector_store %arg11[%c40, %c0_140], %151 {strides = array<i32>} : memref<72x256xf32, #tpu.memory_space<vmem>>, vector<8x256xf32>,
    %c0_141 = arith.constant 0 : index
    %c32_142 = arith.constant 32 : index
    %153 = vector.load %arg10[%c0_141, %c32_142] : memref<8x290xf32, #tpu.memory_space<vmem>>, vector<8x256xf32>
    %154 = vector.broadcast %10 : vector<1x256xf32> to vector<8x256xf32>
    %155 = arith.mulf %153, %154 : vector<8x256xf32>
    %c48 = arith.constant 48 : index
    %c0_143 = arith.constant 0 : index
    %156 = vector.load %arg11[%c48, %c0_143] : memref<72x256xf32, #tpu.memory_space<vmem>>, vector<8x256xf32>
    tpu.vector_store %arg11[%c48, %c0_143], %155 {strides = array<i32>} : memref<72x256xf32, #tpu.memory_space<vmem>>, vector<8x256xf32>,
    %c0_144 = arith.constant 0 : index
    %c33_145 = arith.constant 33 : index
    %157 = vector.load %arg10[%c0_144, %c33_145] : memref<8x290xf32, #tpu.memory_space<vmem>>, vector<8x256xf32>
    %c56 = arith.constant 56 : index
    %c0_146 = arith.constant 0 : index
    %158 = vector.load %arg11[%c56, %c0_146] : memref<72x256xf32, #tpu.memory_space<vmem>>, vector<8x256xf32>
    tpu.vector_store %arg11[%c56, %c0_146], %157 {strides = array<i32>} : memref<72x256xf32, #tpu.memory_space<vmem>>, vector<8x256xf32>,
    %c0_147 = arith.constant 0 : index
    %c34_148 = arith.constant 34 : index
    %159 = vector.load %arg10[%c0_147, %c34_148] : memref<8x290xf32, #tpu.memory_space<vmem>>, vector<8x256xf32>
    %160 = vector.broadcast %11 : vector<1x256xf32> to vector<8x256xf32>
    %161 = arith.mulf %159, %160 : vector<8x256xf32>
    %c64 = arith.constant 64 : index
    %c0_149 = arith.constant 0 : index
    %162 = vector.load %arg11[%c64, %c0_149] : memref<72x256xf32, #tpu.memory_space<vmem>>, vector<8x256xf32>
    tpu.vector_store %arg11[%c64, %c0_149], %161 {strides = array<i32>} : memref<72x256xf32, #tpu.memory_space<vmem>>, vector<8x256xf32>,
    %c0_150 = arith.constant 0 : index
    %c0_151 = arith.constant 0 : index
    %163 = vector.load %arg11[%c0_150, %c0_151] : memref<72x256xf32, #tpu.memory_space<vmem>>, vector<72x256xf32>
    %cst_152 = arith.constant dense<0.000000e+00> : vector<8x256xf32>
    %164 = tpu.matmul %5, %163, %cst_152 {dimension_numbers = #tpu.dot_dimension_numbers<[1], [0], [0], [1], [0, 0, 1, 1], [], []>} : vector<8x72xf32>, vector<72x256xf32>, vector<8x256xf32> -> vector<8x256xf32>
    %165 = vector.broadcast %7 : vector<8x1xf32> to vector<8x256xf32>
    %166 = arith.addf %164, %165 : vector<8x256xf32>
    %cst_153 = arith.constant 0.000000e+00 : f32
    %167 = vector.broadcast %cst_153 : f32 to vector<8x256xf32>
    %168 = arith.maximumf %166, %167 : vector<8x256xf32>
    %c0_154 = arith.constant 0 : index
    %c0_155 = arith.constant 0 : index
    %c0_156 = arith.constant 0 : index
    %169 = vector.load %arg12[%c0_154, %c0_155, %c0_156] : memref<2x8x256xf32, #tpu.memory_space<vmem>>, vector<1x8x256xf32>
    %170 = vector.shape_cast %169 : vector<1x8x256xf32> to vector<8x256xf32>
    %171 = vector.shape_cast %168 : vector<8x256xf32> to vector<1x8x256xf32>
    tpu.vector_store %arg12[%c0_154, %c0_155, %c0_156], %171 {strides = array<i32>} : memref<2x8x256xf32, #tpu.memory_space<vmem>>, vector<1x8x256xf32>,
    %cst_157 = arith.constant dense<0.000000e+00> : vector<8xf32>
    %172 = vector.multi_reduction <add>, %168, %cst_157 [1] : vector<8x256xf32> to vector<8xf32>
    %173 = vector.shape_cast %172 : vector<8xf32> to vector<8x1xf32>
    %174 = arith.addf %124, %173 : vector<8x1xf32>
    %175 = arith.mulf %168, %168 : vector<8x256xf32>
    %cst_158 = arith.constant dense<0.000000e+00> : vector<8xf32>
    %176 = vector.multi_reduction <add>, %175, %cst_158 [1] : vector<8x256xf32> to vector<8xf32>
    %177 = vector.shape_cast %176 : vector<8xf32> to vector<8x1xf32>
    %178 = arith.addf %125, %177 : vector<8x1xf32>
    %c1_159 = arith.constant 1 : index
    %c0_160 = arith.constant 0 : index
    %c0_161 = arith.constant 0 : index
    %179 = vector.load %arg12[%c1_159, %c0_160, %c0_161] : memref<2x8x256xf32, #tpu.memory_space<vmem>>, vector<1x8x256xf32>
    %180 = vector.shape_cast %179 : vector<1x8x256xf32> to vector<8x256xf32>
    %181 = vector.broadcast %121 : vector<8x1xf32> to vector<8x256xf32>
    %182 = arith.mulf %180, %181 : vector<8x256xf32>
    %183 = vector.broadcast %123 : vector<8x1xf32> to vector<8x256xf32>
    %184 = arith.addf %182, %183 : vector<8x256xf32>
    %c0_162 = arith.constant 0 : index
    %c17_163 = arith.constant 17 : index
    %185 = vector.load %arg10[%c0_162, %c17_163] : memref<8x290xf32, #tpu.memory_space<vmem>>, vector<8x256xf32>
    tpu.vector_store %arg10[%c0_162, %c17_163], %184 {strides = array<i32>} : memref<8x290xf32, #tpu.memory_space<vmem>>, vector<8x256xf32>,
    %c0_164 = arith.constant 0 : index
    %c0_165 = arith.constant 0 : index
    %186 = vector.load %arg10[%c0_164, %c0_165] : memref<8x290xf32, #tpu.memory_space<vmem>>, vector<8x256xf32>
    %187 = vector.broadcast %10 : vector<1x256xf32> to vector<8x256xf32>
    %188 = arith.mulf %186, %187 : vector<8x256xf32>
    %c0_166 = arith.constant 0 : index
    %c0_167 = arith.constant 0 : index
    %189 = vector.load %arg11[%c0_166, %c0_167] : memref<72x256xf32, #tpu.memory_space<vmem>>, vector<8x256xf32>
    tpu.vector_store %arg11[%c0_166, %c0_167], %188 {strides = array<i32>} : memref<72x256xf32, #tpu.memory_space<vmem>>, vector<8x256xf32>,
    %c0_168 = arith.constant 0 : index
    %c1_169 = arith.constant 1 : index
    %190 = vector.load %arg10[%c0_168, %c1_169] : memref<8x290xf32, #tpu.memory_space<vmem>>, vector<8x256xf32>
    %c8_170 = arith.constant 8 : index
    %c0_171 = arith.constant 0 : index
    %191 = vector.load %arg11[%c8_170, %c0_171] : memref<72x256xf32, #tpu.memory_space<vmem>>, vector<8x256xf32>
    tpu.vector_store %arg11[%c8_170, %c0_171], %190 {strides = array<i32>} : memref<72x256xf32, #tpu.memory_space<vmem>>, vector<8x256xf32>,
    %c0_172 = arith.constant 0 : index
    %c2_173 = arith.constant 2 : index
    %192 = vector.load %arg10[%c0_172, %c2_173] : memref<8x290xf32, #tpu.memory_space<vmem>>, vector<8x256xf32>
    %193 = vector.broadcast %11 : vector<1x256xf32> to vector<8x256xf32>
    %194 = arith.mulf %192, %193 : vector<8x256xf32>
    %c16_174 = arith.constant 16 : index
    %c0_175 = arith.constant 0 : index
    %195 = vector.load %arg11[%c16_174, %c0_175] : memref<72x256xf32, #tpu.memory_space<vmem>>, vector<8x256xf32>
    tpu.vector_store %arg11[%c16_174, %c0_175], %194 {strides = array<i32>} : memref<72x256xf32, #tpu.memory_space<vmem>>, vector<8x256xf32>,
    %c0_176 = arith.constant 0 : index
    %c16_177 = arith.constant 16 : index
    %196 = vector.load %arg10[%c0_176, %c16_177] : memref<8x290xf32, #tpu.memory_space<vmem>>, vector<8x256xf32>
    %197 = vector.broadcast %10 : vector<1x256xf32> to vector<8x256xf32>
    %198 = arith.mulf %196, %197 : vector<8x256xf32>
    %c24_178 = arith.constant 24 : index
    %c0_179 = arith.constant 0 : index
    %199 = vector.load %arg11[%c24_178, %c0_179] : memref<72x256xf32, #tpu.memory_space<vmem>>, vector<8x256xf32>
    tpu.vector_store %arg11[%c24_178, %c0_179], %198 {strides = array<i32>} : memref<72x256xf32, #tpu.memory_space<vmem>>, vector<8x256xf32>,
    %c0_180 = arith.constant 0 : index
    %c17_181 = arith.constant 17 : index
    %200 = vector.load %arg10[%c0_180, %c17_181] : memref<8x290xf32, #tpu.memory_space<vmem>>, vector<8x256xf32>
    %c32_182 = arith.constant 32 : index
    %c0_183 = arith.constant 0 : index
    %201 = vector.load %arg11[%c32_182, %c0_183] : memref<72x256xf32, #tpu.memory_space<vmem>>, vector<8x256xf32>
    tpu.vector_store %arg11[%c32_182, %c0_183], %200 {strides = array<i32>} : memref<72x256xf32, #tpu.memory_space<vmem>>, vector<8x256xf32>,
    %c0_184 = arith.constant 0 : index
    %c18_185 = arith.constant 18 : index
    %202 = vector.load %arg10[%c0_184, %c18_185] : memref<8x290xf32, #tpu.memory_space<vmem>>, vector<8x256xf32>
    %203 = vector.broadcast %11 : vector<1x256xf32> to vector<8x256xf32>
    %204 = arith.mulf %202, %203 : vector<8x256xf32>
    %c40_186 = arith.constant 40 : index
    %c0_187 = arith.constant 0 : index
    %205 = vector.load %arg11[%c40_186, %c0_187] : memref<72x256xf32, #tpu.memory_space<vmem>>, vector<8x256xf32>
    tpu.vector_store %arg11[%c40_186, %c0_187], %204 {strides = array<i32>} : memref<72x256xf32, #tpu.memory_space<vmem>>, vector<8x256xf32>,
    %c0_188 = arith.constant 0 : index
    %c32_189 = arith.constant 32 : index
    %206 = vector.load %arg10[%c0_188, %c32_189] : memref<8x290xf32, #tpu.memory_space<vmem>>, vector<8x256xf32>
    %207 = vector.broadcast %10 : vector<1x256xf32> to vector<8x256xf32>
    %208 = arith.mulf %206, %207 : vector<8x256xf32>
    %c48_190 = arith.constant 48 : index
    %c0_191 = arith.constant 0 : index
    %209 = vector.load %arg11[%c48_190, %c0_191] : memref<72x256xf32, #tpu.memory_space<vmem>>, vector<8x256xf32>
    tpu.vector_store %arg11[%c48_190, %c0_191], %208 {strides = array<i32>} : memref<72x256xf32, #tpu.memory_space<vmem>>, vector<8x256xf32>,
    %c0_192 = arith.constant 0 : index
    %c33_193 = arith.constant 33 : index
    %210 = vector.load %arg10[%c0_192, %c33_193] : memref<8x290xf32, #tpu.memory_space<vmem>>, vector<8x256xf32>
    %c56_194 = arith.constant 56 : index
    %c0_195 = arith.constant 0 : index
    %211 = vector.load %arg11[%c56_194, %c0_195] : memref<72x256xf32, #tpu.memory_space<vmem>>, vector<8x256xf32>
    tpu.vector_store %arg11[%c56_194, %c0_195], %210 {strides = array<i32>} : memref<72x256xf32, #tpu.memory_space<vmem>>, vector<8x256xf32>,
    %c0_196 = arith.constant 0 : index
    %c34_197 = arith.constant 34 : index
    %212 = vector.load %arg10[%c0_196, %c34_197] : memref<8x290xf32, #tpu.memory_space<vmem>>, vector<8x256xf32>
    %213 = vector.broadcast %11 : vector<1x256xf32> to vector<8x256xf32>
    %214 = arith.mulf %212, %213 : vector<8x256xf32>
    %c64_198 = arith.constant 64 : index
    %c0_199 = arith.constant 0 : index
    %215 = vector.load %arg11[%c64_198, %c0_199] : memref<72x256xf32, #tpu.memory_space<vmem>>, vector<8x256xf32>
    tpu.vector_store %arg11[%c64_198, %c0_199], %214 {strides = array<i32>} : memref<72x256xf32, #tpu.memory_space<vmem>>, vector<8x256xf32>,
    %c0_200 = arith.constant 0 : index
    %c0_201 = arith.constant 0 : index
    %216 = vector.load %arg11[%c0_200, %c0_201] : memref<72x256xf32, #tpu.memory_space<vmem>>, vector<72x256xf32>
    %cst_202 = arith.constant dense<0.000000e+00> : vector<8x256xf32>
    %217 = tpu.matmul %5, %216, %cst_202 {dimension_numbers = #tpu.dot_dimension_numbers<[1], [0], [0], [1], [0, 0, 1, 1], [], []>} : vector<8x72xf32>, vector<72x256xf32>, vector<8x256xf32> -> vector<8x256xf32>
    %218 = vector.broadcast %7 : vector<8x1xf32> to vector<8x256xf32>
    %219 = arith.addf %217, %218 : vector<8x256xf32>
    %cst_203 = arith.constant 0.000000e+00 : f32
    %220 = vector.broadcast %cst_203 : f32 to vector<8x256xf32>
    %221 = arith.maximumf %219, %220 : vector<8x256xf32>
    %c1_204 = arith.constant 1 : index
    %c0_205 = arith.constant 0 : index
    %c0_206 = arith.constant 0 : index
    %222 = vector.load %arg12[%c1_204, %c0_205, %c0_206] : memref<2x8x256xf32, #tpu.memory_space<vmem>>, vector<1x8x256xf32>
    %223 = vector.shape_cast %222 : vector<1x8x256xf32> to vector<8x256xf32>
    %224 = vector.shape_cast %221 : vector<8x256xf32> to vector<1x8x256xf32>
    tpu.vector_store %arg12[%c1_204, %c0_205, %c0_206], %224 {strides = array<i32>} : memref<2x8x256xf32, #tpu.memory_space<vmem>>, vector<1x8x256xf32>,
    %cst_207 = arith.constant dense<0.000000e+00> : vector<8xf32>
    %225 = vector.multi_reduction <add>, %221, %cst_207 [1] : vector<8x256xf32> to vector<8xf32>
    %226 = vector.shape_cast %225 : vector<8xf32> to vector<8x1xf32>
    %227 = arith.addf %174, %226 : vector<8x1xf32>
    %228 = arith.mulf %221, %221 : vector<8x256xf32>
    %cst_208 = arith.constant dense<0.000000e+00> : vector<8xf32>
    %229 = vector.multi_reduction <add>, %228, %cst_208 [1] : vector<8x256xf32> to vector<8xf32>
    %230 = vector.shape_cast %229 : vector<8xf32> to vector<8x1xf32>
    %231 = arith.addf %178, %230 : vector<8x1xf32>
    %cst_209 = arith.constant 0.001953125 : f32
    %232 = vector.broadcast %cst_209 : f32 to vector<8x1xf32>
    %233 = arith.mulf %227, %232 : vector<8x1xf32>
    %cst_210 = arith.constant 0.001953125 : f32
    %234 = vector.broadcast %cst_210 : f32 to vector<8x1xf32>
    %235 = arith.mulf %231, %234 : vector<8x1xf32>
    %236 = arith.mulf %233, %233 : vector<8x1xf32>
    %237 = arith.subf %235, %236 : vector<8x1xf32>
    %cst_211 = arith.constant 9.99999974E-6 : f32
    %238 = vector.broadcast %cst_211 : f32 to vector<8x1xf32>
    %239 = arith.addf %237, %238 : vector<8x1xf32>
    %240 = math.rsqrt %239 : vector<8x1xf32>
    %241 = arith.mulf %8, %240 : vector<8x1xf32>
    %242 = arith.mulf %233, %241 : vector<8x1xf32>
    %243 = arith.subf %9, %242 : vector<8x1xf32>
    %c0_212 = arith.constant 0 : index
    %c0_213 = arith.constant 0 : index
    %c0_214 = arith.constant 0 : index
    %244 = vector.load %arg12[%c0_212, %c0_213, %c0_214] : memref<2x8x256xf32, #tpu.memory_space<vmem>>, vector<1x8x256xf32>
    %245 = vector.shape_cast %244 : vector<1x8x256xf32> to vector<8x256xf32>
    %246 = vector.broadcast %241 : vector<8x1xf32> to vector<8x256xf32>
    %247 = arith.mulf %245, %246 : vector<8x256xf32>
    %248 = vector.broadcast %243 : vector<8x1xf32> to vector<8x256xf32>
    %249 = arith.addf %247, %248 : vector<8x256xf32>
    %c0_215 = arith.constant 0 : index
    %c0_216 = arith.constant 0 : index
    %c0_217 = arith.constant 0 : index
    %250 = vector.load %arg8[%c0_215, %c0_216, %c0_217] : memref<2x8x256xf32, #tpu.memory_space<vmem>>, vector<1x8x256xf32>
    %251 = vector.shape_cast %250 : vector<1x8x256xf32> to vector<8x256xf32>
    %252 = vector.shape_cast %249 : vector<8x256xf32> to vector<1x8x256xf32>
    tpu.vector_store %arg8[%c0_215, %c0_216, %c0_217], %252 {strides = array<i32>} : memref<2x8x256xf32, #tpu.memory_space<vmem>>, vector<1x8x256xf32>,
    %c1_218 = arith.constant 1 : index
    %c0_219 = arith.constant 0 : index
    %c0_220 = arith.constant 0 : index
    %253 = vector.load %arg12[%c1_218, %c0_219, %c0_220] : memref<2x8x256xf32, #tpu.memory_space<vmem>>, vector<1x8x256xf32>
    %254 = vector.shape_cast %253 : vector<1x8x256xf32> to vector<8x256xf32>
    %255 = vector.broadcast %241 : vector<8x1xf32> to vector<8x256xf32>
    %256 = arith.mulf %254, %255 : vector<8x256xf32>
    %257 = vector.broadcast %243 : vector<8x1xf32> to vector<8x256xf32>
    %258 = arith.addf %256, %257 : vector<8x256xf32>
    %c1_221 = arith.constant 1 : index
    %c0_222 = arith.constant 0 : index
    %c0_223 = arith.constant 0 : index
    %259 = vector.load %arg8[%c1_221, %c0_222, %c0_223] : memref<2x8x256xf32, #tpu.memory_space<vmem>>, vector<1x8x256xf32>
    %260 = vector.shape_cast %259 : vector<1x8x256xf32> to vector<8x256xf32>
    %261 = vector.shape_cast %258 : vector<8x256xf32> to vector<1x8x256xf32>
    tpu.vector_store %arg8[%c1_221, %c0_222, %c0_223], %261 {strides = array<i32>} : memref<2x8x256xf32, #tpu.memory_space<vmem>>, vector<1x8x256xf32>,
    return
  }
}

</mosaic_0001>

<bundles_post_ra>
// kernel: deconv_block_forward.1
= control target key start
LH: loop header
LB: loop body
LE: loop exit
PB: predicated region body
PF: predicated region fallthrough
CT: control target
= control target key end

     0   :  { %v62_v0 = vlaneseq  ;;  %vm30_vm0 = vcmask 273408   ;;  %v1432_v3 = vmov 0.0   ;;  %s1433_s9 = smov 17   ;;  %vm34_vm1 = vcmask 277504   ;;  %s1435_s13 = smov 2   ;;  %s1961_s0 = inlined_call_operand.vmem [shape: f32[2,4,256], index: 0, kind: input, shape index: {}]   ;;  %s1962_s7 = inlined_call_operand.vmem [shape: f32[2,256], index: 7, kind: input, shape index: {}]   ;;  %s1963_s2 = inlined_call_operand.vmem [shape: f32[8,1], index: 2, kind: input, shape index: {}]   ;;  %s1964_s1 = inlined_call_operand.vmem [shape: f32[8,36], index: 1, kind: input, shape index: {}]   ;;  %s1965_s5 = inlined_call_operand.vmem [shape: f32[8,1], index: 5, kind: input, shape index: {}]   ;;  %s1966_s6 = inlined_call_operand.vmem [shape: f32[8,1], index: 6, kind: input, shape index: {}]   ;;  %s1967_s4 = inlined_call_operand.vmem [shape: f32[8,1], index: 4, kind: input, shape index: {}]   ;;  %s1968_s3 = inlined_call_operand.vmem [shape: f32[8,72], index: 3, kind: input, shape index: {}]   ;;  %s1969_s8 = inlined_call_operand.vmem [shape: f32[2,8,256], index: 8, kind: output, shape index: {}]  }
   0x1   :  { %v45_v1 = vld [vmem:[%s1961_s0] sm:$0xff]  ;;  %v1350_v2 = vld [vmem:[%s1961_s0 + $0x8] sm:$0xff]  ;;  %29 = vst [vmem:[#allocation2] sm:$0xff] %v1432_v3  ;;  %31 = vst.msk [vmem:[#allocation2 + $0x8] sm:$0xf] %vm30_vm0, %v1432_v3  ;;  %370 = vmatprep.mubr.f32.mxu0 %v1432_v3  ;;  %639 = vmatprep.mubr.f32.mxu1 %v1432_v3  ;;  %s1436_s14 = smov 18  }
   0x2   :  { %32 = vst [vmem:[#allocation3] sm:$0xff] %v1432_v3  ;;  %47 = vrot.lane.b32.xlu0 %v45_v1, %s1433_s9  ;;  %394 = vrot.lane.b32.xlu1 %v1350_v2, %s1433_s9  ;;  %v63_v4 = vshrl.u32 %v62_v0, 7  ;;  %v42_v5 = vld [vmem:[%s1962_s7] ss:$2 sm:$0x3]  ;;  %35 = vst.msk [vmem:[#allocation3 + $0x10] sm:$0xff] %vm34_vm1, %v1432_v3 }
   0x3   :  { %v1346_v6 = vld [vmem:[%s1962_s7 + $0x1] ss:$2 sm:$0x3]  ;;  %s1434_s7 = smov 16   ;;  %s1437_s15 = smov 32   ;;  %vm54_vm2 = vcmask 1043592  }
   0x4   :  { %v64_v7 = vsub.s32 0, %v63_v4  ;;  %v68_v8 = vsub.s32 1, %v63_v4  ;;  %s1438_s16 = smov 34   ;;  %vm55_vm3 = vcmask 1047556   ;;  %vm50_vm4 = vcmask 138240   ;;  %s1439_s17 = smov 111  }
   0x5   :  { %vm58_vm5 = vcmask 134144   ;;  %vm1535_vm6 = vmor %vm55_vm3, %vm54_vm2  ;;  %s1440_s18 = smov 95   ;;  %s1441_s19 = smov 127   ;;  %vm139_vm7 = vcmask 130048   ;;  %vm112_vm8 = vcmask 15360   ;;  %vm185_vm9 = vcmask 146432  }
   0x6   :  { %v1512_v9 = vrot.slane %v42_v5, %v64_v7  ;;  %v1514_v10 = vrot.slane %v42_v5, %v68_v8  ;;  %v1516_v11 = vrot.slane %v1346_v6, %v64_v7  ;;  %v1518_v12 = vrot.slane %v1346_v6, %v68_v8  ;;  %s1442_s20 = smov 96   ;;  %s1443_s21 = smov 126  }
   0x7   :  { %s1444_s22 = smov 112   ;;  %s1445_s23 = smov 94   ;;  %vm213_vm10 = vcmask 261120   ;;  %vm90_vm11 = vcmask 1039360   ;;  %vm247_vm12 = vcmask 777216   ;;  %vm173_vm13 = vcmask 908288  }
   0x8   :  { %v1524_v13 = vcombine.low %v1512_v9, %v1514_v10  ;;  %v108_v14 = vcombine.low %v1516_v11, %v1518_v12  ;;  %s1446_s24 = smov 110   ;;  %vm201_vm14 = vcmask 900096   ;;  %vm127_vm15 = vcmask 1031168  }
   0x9   :  { %vm155_vm0 = vcmask 916480   ;;  %vm228_vm2 = vcmask 785408   ;;  %vm273_vm3 = vcmask 769024  }
   0xa   :  { %136 = vrot.lane.b32.xlu1 %v1524_v13, %s1434_s7  ;;  %109 = vrot.lane.b32.xlu0 %v108_v14, %s1435_s13 }
   0xe   :  { %182 = vrot.lane.b32.xlu1 %v108_v14, %s1436_s14  ;;  %210 = vrot.lane.b32.xlu0 %v1524_v13, %s1437_s15 }
  0x12   :  { %256 = vrot.lane.b32.xlu0 %v108_v14, %s1438_s16 }
  0x74   :  { %v48_v15 = vpop.permute.xlu0 %47  ;;  %v395_v19 = vpop.permute.xlu1 %394 }
  0x75   :  { %v49_v17 = vrot.slane %v48_v15, 4  ;;  %v396_v20 = vrot.slane %v395_v19, 4 }
  0x77   :  { %v51_v18 = vsel %vm50_vm4, %v49_v17, %v48_v15  ;;  %59 = vst.msk [vmem:[#allocation2 + $0x8] sm:$0xf] %vm58_vm5, %v49_v17  ;;  %v397_v22 = vsel %vm50_vm4, %v396_v20, %v395_v19 }
  0x78   :  { %57 = vst.msk [vmem:[#allocation2] sm:$0xff] %vm1535_vm6, %v51_v18 }
  0x7c   :  { %v110_v21 = vpop.permute.xlu0 %109  ;;  %v137_v35 = vpop.permute.xlu1 %136 }
  0x7d   :  { %v1561_v38 = vrot.slane %v137_v35, 4  ;;  %v1563_v39 = vrot.slane %v110_v21, 4 }
  0x7e   :  { %v163_v23 = vld [vmem:[#allocation2 + $0x8] sm:$0xf] }
  0x7f   :  { %v209_v24 = vld [vmem:[#allocation2 + $0x8] sm:$0xf]  ;;  %v1544_v25 = vld [vmem:[#allocation2] sm:$0xff]  ;;  %171 = vrot.lane.b32.xlu1 %v163_v23, %s1439_s17  ;;  %v140_v41 = vsel %vm139_vm7, %v1561_v38, %v137_v35  ;;  %v1578_v46 = vsel %vm112_vm8, %v1563_v39, %v110_v21 }
  0x80   :  { %v1424_v26 = vld [vmem:[#allocation2 + $0x8] ss:$0 sps:$4 sm:$0xff]   ;;  %243 = vrot.lane.b32.xlu0 %v1544_v25, %s1440_s18  ;;  %v211_v27 = vpop.permute.xlu0 %210  ;;  %400 = vst.msk [vmem:[#allocation2] sm:$0xff] %vm1535_vm6, %v397_v22  ;;  %v72_v34 = vmul.f32 %v1524_v13, %v1544_v25  ;;  %v143_v44 = vmul.f32 %v140_v41, %v1544_v25  ;;  %v183_v47 = vpop.permute.xlu1 %182  ;;  %v82_v48 = vcombine.low %v1544_v25, %v1544_v25  ;;  %vm295_vm6 = vcmask 293888  }
  0x81   :  { %v1425_v28 = vld [vmem:[#allocation2 + $0x8] ss:$0 sps:$4 sm:$0xff]   ;;  %v1551_v31 = vrot.slane %v211_v27, 4  ;;  %v116_v49 = vmul.f32 %v1578_v46, %v1544_v25  ;;  %v1586_v50 = vrot.slane %v183_v47, 4  ;;  %v166_v52 = vcombine.high %v1544_v25, %v1544_v25 }
  0x82   :  { %v98_v29 = vld [vmem:[#allocation2 + $0x8] sm:$0xf]  ;;  %76 = vst [vmem:[#allocation4] sm:$0xf] %v72_v34  ;;  %v74_v36 = vcombine.high %v72_v34, %v72_v34  ;;  %v147_v63 = vcombine.low %v143_v44, %v143_v44 }
  0x83   :  { %v255_v30 = vld [vmem:[#allocation2 + $0x8] sm:$0xf]  ;;  %86 = vrot.lane.b32.xlu1 %v1544_v25, %s1441_s19  ;;  %v218_v37 = vmul.f32 %v1551_v31, %v209_v24  ;;  %v117_v43 = vmul.f32 %v1563_v39, %v98_v29  ;;  %v186_v53 = vsel %vm185_vm9, %v1586_v50, %v183_v47  ;;  %v214_v57 = vsel %vm213_vm10, %v1551_v31, %v211_v27 }
  0x84   :  { %v181_v32 = vld [vmem:[#allocation2 + $0x8] sm:$0xf]  ;;  %167 = vrot.lane.b32.xlu0 %v1544_v25, %s1439_s17  ;;  %77 = vst [vmem:[#allocation4 + $0x8] sm:$0xf] %v74_v36  ;;  %v257_v40 = vpop.permute.xlu0 %256  ;;  %v189_v56 = vmul.f32 %v186_v53, %v1544_v25  ;;  %v217_v59 = vmul.f32 %v214_v57, %v1544_v25  ;;  %v120_v61 = vcombine.high %v116_v49, %v116_v49 }
  0x85   :  { %v135_v33 = vld [vmem:[#allocation2 + $0x8] sm:$0xf]  ;;  %v1569_v42 = vrot.slane %v257_v40, 4  ;;  %v190_v55 = vmul.f32 %v1586_v50, %v181_v32 }
  0x86   :  { %401 = vst.msk [vmem:[#allocation2 + $0x8] sm:$0xf] %vm58_vm5, %v396_v20  ;;  %v144_v60 = vmul.f32 %v1561_v38, %v135_v33  ;;  %v221_v0 = vcombine.high %v217_v59, %v217_v59  ;;  %v193_v1 = vcombine.low %v189_v56, %v189_v56  ;;  %vm299_vm5 = vcmask 1043456  }
  0x87   :  { %226 = vrot.lane.b32.xlu1 %v218_v37, %s1442_s20  ;;  %v263_v45 = vmul.f32 %v1569_v42, %v255_v30  ;;  %v1592_v51 = vsel %vm34_vm1, %v1569_v42, %v257_v40  ;;  %v194_v58 = vcombine.low %v190_v55, %v190_v55  ;;  %v1616_v2 = vld [vmem:[#allocation2] sm:$0xff]  ;;  %v1447_v37 = vmov 0  }
  0x88   :  { %88 = vrot.lane.b32.xlu0 %v1424_v26, %s1441_s19  ;;  %v262_v54 = vmul.f32 %v1592_v51, %v1544_v25  ;;  %v148_v62 = vcombine.low %v144_v60, %v144_v60  ;;  %v448_v7 = vmul.f32 %v1616_v2, %v140_v41  ;;  %v413_v15 = vcombine.low %v1616_v2, %v1616_v2 }
  0x89   :  { %v470_v18 = vcombine.high %v1616_v2, %v1616_v2  ;;  %v485_v20 = vmul.f32 %v1616_v2, %v186_v53  ;;  %v429_v22 = vmul.f32 %v1616_v2, %v1578_v46  ;;  %v505_v24 = vmul.f32 %v1616_v2, %v214_v57  ;;  %1423 = vset.pattern.permute.xlu0 %v1447_v37 }
  0x8a   :  { %v266_v4 = vcombine.high %v262_v54, %v262_v54  ;;  %v452_v30 = vcombine.low %v448_v7, %v448_v7  ;;  %v542_v32 = vmul.f32 %v1616_v2, %v1592_v51  ;;  %1422 = vset.pattern.permute.xlu1 %v1447_v37 }
  0x8b   :  { %245 = vrot.lane.b32.xlu1 %v1425_v28, %s1440_s18  ;;  %v433_v28 = vcombine.high %v429_v22, %v429_v22  ;;  %v509_v33 = vcombine.high %v505_v24, %v505_v24 }
  0x8c   :  { %125 = vrot.lane.b32.xlu0 %v117_v43, %s1443_s21  ;;  %v546_v34 = vcombine.high %v542_v32, %v542_v32 }
  0x8d   :  { %v467_v5 = vld [vmem:[#allocation2 + $0x8] sm:$0xf] }
  0x8e   :  { %v1426_v6 = vld [vmem:[#allocation2 + $0x8] ss:$0 sps:$4 sm:$0xff]  }
  0x8f   :  { %151 = vrot.lane.b32.xlu1 %v143_v44, %s1444_s22  ;;  %v428_v8 = vld [vmem:[#allocation2 + $0x8] sm:$0xf] }
  0x90   :  { %271 = vrot.lane.b32.xlu0 %v263_v45, %s1445_s23  ;;  %v430_v14 = vmul.f32 %v428_v8, %v1563_v39  ;;  %v504_v16 = vld [vmem:[#allocation2 + $0x8] sm:$0xf] }
  0x91   :  { %v506_v17 = vmul.f32 %v504_v16, %v1551_v31  ;;  %v1427_v19 = vld [vmem:[#allocation2 + $0x8] ss:$0 sps:$4 sm:$0xff]   ;;  %v489_v31 = vcombine.low %v485_v20, %v485_v20 }
  0x92   :  { %v447_v21 = vld [vmem:[#allocation2 + $0x8] sm:$0xf] }
  0x93   :  { %84 = vrot.lane.b32.xlu1 %v82_v48, %s1441_s19  ;;  %v449_v23 = vmul.f32 %v447_v21, %v1561_v38  ;;  %v484_v25 = vld [vmem:[#allocation2 + $0x8] sm:$0xf]  ;;  %v38_v38 = vld [vmem:[%s1963_s2] sm:$0xff] }
  0x94   :  { %121 = vrot.lane.b32.xlu0 %v116_v49, %s1443_s21  ;;  %v486_v27 = vmul.f32 %v484_v25, %v1586_v50  ;;  %v541_v35 = vld [vmem:[#allocation2 + $0x8] sm:$0xf]  ;;  %v403_v49 = vmul.f32 %v1616_v2, %v1524_v13 }
  0x95   :  { %v453_v26 = vcombine.low %v449_v23, %v449_v23  ;;  %v543_v36 = vmul.f32 %v541_v35, %v1569_v42 }
  0x96   :  { %v490_v29 = vcombine.low %v486_v27, %v486_v27 }
  0x97   :  { %241 = vrot.lane.b32.xlu1 %v82_v48, %s1440_s18 }
  0x98   :  { %169 = vrot.lane.b32.xlu0 %v166_v52, %s1439_s17  ;;  %v405_v52 = vcombine.high %v403_v49, %v403_v49 }
  0x9b   :  { %267 = vrot.lane.b32.xlu1 %v262_v54, %s1445_s23 }
  0x9c   :  { %197 = vrot.lane.b32.xlu0 %v189_v56, %s1446_s24 }
  0x9f   :  { %199 = vrot.lane.b32.xlu1 %v194_v58, %s1446_s24 }
  0xa0   :  { %222 = vrot.lane.b32.xlu0 %v217_v59, %s1442_s20 }
  0xa3   :  { %123 = vrot.lane.b32.xlu1 %v120_v61, %s1443_s21 }
  0xa4   :  { %153 = vrot.lane.b32.xlu0 %v148_v62, %s1444_s22 }
  0xa7   :  { %149 = vrot.lane.b32.xlu1 %v147_v63, %s1444_s22 }
  0xa8   :  { %224 = vrot.lane.b32.xlu0 %v221_v0, %s1442_s20 }
  0xab   :  { %195 = vrot.lane.b32.xlu1 %v193_v1, %s1446_s24 }
  0xac   :  { %417 = vrot.lane.b32.xlu0 %v1616_v2, %s1441_s19 }
  0xaf   :  { %269 = vrot.lane.b32.xlu1 %v266_v4, %s1445_s23 }
  0xb0   :  { %530 = vrot.lane.b32.xlu0 %v1616_v2, %s1440_s18 }
  0xb3   :  { %475 = vrot.lane.b32.xlu1 %v467_v5, %s1439_s17 }
  0xb4   :  { %471 = vrot.lane.b32.xlu0 %v1616_v2, %s1439_s17 }
  0xb7   :  { %419 = vrot.lane.b32.xlu1 %v1426_v6, %s1441_s19 }
  0xb8   :  { %456 = vrot.lane.b32.xlu0 %v448_v7, %s1444_s22 }
  0xbb   :  { %438 = vrot.lane.b32.xlu1 %v430_v14, %s1443_s21 }
  0xbc   :  { %415 = vrot.lane.b32.xlu0 %v413_v15, %s1441_s19 }
  0xbf   :  { %514 = vrot.lane.b32.xlu1 %v506_v17, %s1442_s20 }
  0xc0   :  { %473 = vrot.lane.b32.xlu0 %v470_v18, %s1439_s17 }
  0xc3   :  { %532 = vrot.lane.b32.xlu1 %v1427_v19, %s1440_s18 }
  0xc4   :  { %493 = vrot.lane.b32.xlu0 %v485_v20, %s1446_s24 }
  0xc7   :  { %434 = vrot.lane.b32.xlu1 %v429_v22, %s1443_s21 }
  0xc8   :  { %510 = vrot.lane.b32.xlu0 %v505_v24, %s1442_s20 }
  0xcb   :  { %458 = vrot.lane.b32.xlu1 %v453_v26, %s1444_s22 }
  0xcc   :  { %436 = vrot.lane.b32.xlu0 %v433_v28, %s1443_s21 }
  0xcf   :  { %495 = vrot.lane.b32.xlu1 %v490_v29, %s1446_s24 }
  0xd0   :  { %454 = vrot.lane.b32.xlu0 %v452_v30, %s1444_s22 }
  0xd3   :  { %491 = vrot.lane.b32.xlu1 %v489_v31, %s1446_s24 }
  0xd4   :  { %512 = vrot.lane.b32.xlu0 %v509_v33, %s1442_s20 }
  0xd7   :  { %528 = vrot.lane.b32.xlu1 %v413_v15, %s1440_s18 }
  0xd8   :  { %549 = vrot.lane.b32.xlu0 %v546_v34, %s1445_s23 }
  0xdb   :  { %551 = vrot.lane.b32.xlu1 %v543_v36, %s1445_s23 }
  0xdc   :  { %547 = vrot.lane.b32.xlu0 %v542_v32, %s1445_s23 }
  0xdf   :  { %292 = vperm.xlu1 %1422, %v38_v38  }
  0xf1   :  { %v172_v39 = vpop.permute.xlu1 %171 }
  0xf2   :  { %v244_v40 = vpop.permute.xlu0 %243 }
  0xf5   :  { %v87_v41 = vpop.permute.xlu1 %86 }
  0xf6   :  { %v168_v43 = vpop.permute.xlu0 %167 }
  0xf9   :  { %v227_v44 = vpop.permute.xlu1 %226 }
  0xfa   :  { %v89_v45 = vpop.permute.xlu0 %88 }
  0xfb   :  { %v92_v42 = vsel %vm90_vm11, %v87_v41, %v89_v45 }
  0xfc   :  { %96 = vst [vmem:[#allocation4 + $0x8] sm:$0xf0] %v92_v42 }
  0xfd   :  { %v246_v46 = vpop.permute.xlu1 %245 }
  0xfe   :  { %v249_v47 = vsel %vm247_vm12, %v244_v40, %v246_v46  ;;  %v126_v48 = vpop.permute.xlu0 %125 }
  0xff   :  { %253 = vst [vmem:[#allocation4 + $0x38] sm:$0xf0] %v249_v47 }
 0x101   :  { %v152_v50 = vpop.permute.xlu1 %151 }
 0x102   :  { %v272_v51 = vpop.permute.xlu0 %271 }
 0x103   :  { %v281_v53 = vld [vmem:[#allocation4 + $0x8] sm:$0xff] }
 0x104   :  { %408 = vst [vmem:[#allocation4 + $0x8] sm:$0xf] %v405_v52 }
 0x105   :  { %v85_v54 = vpop.permute.xlu1 %84 }
 0x106   :  { %v91_v55 = vsel %vm90_vm11, %v85_v54, %v87_v41  ;;  %v122_v56 = vpop.permute.xlu0 %121 }
 0x107   :  { %95 = vst [vmem:[#allocation4] sm:$0xf0] %v91_v55 }
 0x109   :  { %v242_v57 = vpop.permute.xlu1 %241 }
 0x10a   :  { %v248_v58 = vsel %vm247_vm12, %v242_v57, %v244_v40  ;;  %v170_v59 = vpop.permute.xlu0 %169 }
 0x10b   :  { %252 = vst [vmem:[#allocation4 + $0x30] sm:$0xf0] %v248_v58  ;;  %v174_v60 = vsel %vm173_vm13, %v168_v43, %v170_v59  ;;  %v175_v13 = vsel %vm173_vm13, %v170_v59, %v172_v39  ;;  %v1691_v43 = vld [vmem:[%s1964_s1] sm:$0xff] }
 0x10c   :  { %178 = vst [vmem:[#allocation4 + $0x20] sm:$0xf] %v174_v60  ;;  %179 = vst [vmem:[#allocation4 + $0x28] sm:$0xf] %v175_v13 }
 0x10d   :  { %v268_v61 = vpop.permute.xlu1 %267 }
 0x10e   :  { %v198_v62 = vpop.permute.xlu0 %197  ;;  %v280_v63 = vld [vmem:[#allocation4] sm:$0xff] }
 0x10f   :  { %407 = vst [vmem:[#allocation4] sm:$0xf] %v403_v49 }
 0x111   :  { %v200_v0 = vpop.permute.xlu1 %199 }
 0x112   :  { %v203_v1 = vsel %vm201_vm14, %v198_v62, %v200_v0  ;;  %v223_v2 = vpop.permute.xlu0 %222 }
 0x113   :  { %207 = vst [vmem:[#allocation4 + $0x28] sm:$0xf0] %v203_v1 }
 0x115   :  { %v124_v4 = vpop.permute.xlu1 %123 }
 0x116   :  { %v128_v5 = vsel %vm127_vm15, %v122_v56, %v124_v4  ;;  %v129_v6 = vsel %vm127_vm15, %v124_v4, %v126_v48  ;;  %v154_v7 = vpop.permute.xlu0 %153 }
 0x117   :  { %132 = vst [vmem:[#allocation4 + $0x10] sm:$0xf] %v128_v5  ;;  %133 = vst [vmem:[#allocation4 + $0x18] sm:$0xf] %v129_v6  ;;  %v157_v8 = vsel %vm155_vm0, %v152_v50, %v154_v7 }
 0x118   :  { %161 = vst [vmem:[#allocation4 + $0x18] sm:$0xf0] %v157_v8 }
 0x119   :  { %v150_v14 = vpop.permute.xlu1 %149 }
 0x11a   :  { %v156_v15 = vsel %vm155_vm0, %v150_v14, %v152_v50  ;;  %v225_v16 = vpop.permute.xlu0 %224  ;;  %v285_v30 = vld [vmem:[#allocation4 + $0x28] sm:$0xff] }
 0x11b   :  { %160 = vst [vmem:[#allocation4 + $0x10] sm:$0xf0] %v156_v15  ;;  %v229_v17 = vsel %vm228_vm2, %v223_v2, %v225_v16  ;;  %v230_v18 = vsel %vm228_vm2, %v225_v16, %v227_v44 }
 0x11c   :  { %233 = vst [vmem:[#allocation4 + $0x30] sm:$0xf] %v229_v17  ;;  %234 = vst [vmem:[#allocation4 + $0x38] sm:$0xf] %v230_v18 }
 0x11d   :  { %v196_v19 = vpop.permute.xlu1 %195 }
 0x11e   :  { %v202_v20 = vsel %vm201_vm14, %v196_v19, %v198_v62  ;;  %v418_v21 = vpop.permute.xlu0 %417 }
 0x11f   :  { %206 = vst [vmem:[#allocation4 + $0x20] sm:$0xf0] %v202_v20  ;;  %v283_v22 = vld [vmem:[#allocation4 + $0x18] sm:$0xff] }
 0x120   :  { %v1358_v23 = vpack.c.bf16 %v283_v22, %v281_v53 }
 0x121   :  { %v270_v24 = vpop.permute.xlu1 %269 }
 0x122   :  { %v274_v25 = vsel %vm273_vm3, %v268_v61, %v270_v24  ;;  %v275_v26 = vsel %vm273_vm3, %v270_v24, %v272_v51  ;;  %1359 = vmatprep.subr.bf16.mxu0 %v1358_v23  ;;  %v1684_v27 = vpop.permute.xlu0 %530  ;;  %v282_v28 = vld [vmem:[#allocation4 + $0x10] sm:$0xff] }
 0x123   :  { %278 = vst [vmem:[#allocation4 + $0x40] sm:$0xf] %v274_v25  ;;  %279 = vst [vmem:[#allocation4 + $0x48] sm:$0xf] %v275_v26  ;;  %v1360_v29 = vpack.c.bf16 %v282_v28, %v280_v63  ;;  %v287_v31 = vld [vmem:[#allocation4 + $0x38] sm:$0xff]  ;;  %v286_v36 = vld [vmem:[#allocation4 + $0x30] sm:$0xff] }
 0x124   :  { %v1362_v32 = vpack.c.bf16 %v287_v31, %v285_v30 }
 0x125   :  { %v476_v33 = vpop.permute.xlu1 %475  ;;  %1361 = vmatpush1.bf16.msra.mxu0 %v1360_v29 }
 0x126   :  { %1363 = vmatprep.subr.bf16.mxu0 %v1362_v32  ;;  %v472_v34 = vpop.permute.xlu0 %471  ;;  %v284_v35 = vld [vmem:[#allocation4 + $0x20] sm:$0xff] }
 0x127   :  { %v1364_v37 = vpack.c.bf16 %v286_v36, %v284_v35 }
 0x129   :  { %v420_v38 = vpop.permute.xlu1 %419  ;;  %1365 = vmatpush1.bf16.msra.mxu0 %v1364_v37 }
 0x12a   :  { %v422_v39 = vsel %vm90_vm11, %v418_v21, %v420_v38  ;;  %v457_v40 = vpop.permute.xlu0 %456  ;;  %v289_v41 = vld [vmem:[#allocation4 + $0x48] sm:$0xf]  ;;  %v288_v44 = vld [vmem:[#allocation4 + $0x40] sm:$0xf] }
 0x12b   :  { %426 = vst [vmem:[#allocation4 + $0x8] sm:$0xf0] %v422_v39  ;;  %1347 = vmatprep.subr.msk.mxu0 %vm299_vm5, %v289_v41 }
 0x12d   :  { %v439_v45 = vpop.permute.xlu1 %438  ;;  %1348 = vmatpush1.msk.msra.mxu0 %vm299_vm5, %v288_v44 }
 0x12e   :  { %v416_v42 = vpop.permute.xlu0 %415  ;;  %1349 = vmatmul.mubr.msk.f32.vlgmr.msra.gmra.mrb[0].mxu0 %vm295_vm6, %v1691_v43 }
 0x12f   :  { %v421_v46 = vsel %vm90_vm11, %v416_v42, %v418_v21  ;;  %998 = vmatprep.mubr.f32.mxu0 %v1432_v3 }
 0x130   :  { %425 = vst [vmem:[#allocation4] sm:$0xf0] %v421_v46 }
 0x131   :  { %v515_v47 = vpop.permute.xlu1 %514 }
 0x132   :  { %v474_v48 = vpop.permute.xlu0 %473  ;;  %v560_v6 = vld [vmem:[#allocation4 + $0x8] sm:$0xff] }
 0x133   :  { %v477_v49 = vsel %vm173_vm13, %v472_v34, %v474_v48  ;;  %v478_v50 = vsel %vm173_vm13, %v474_v48, %v476_v33 }
 0x134   :  { %481 = vst [vmem:[#allocation4 + $0x20] sm:$0xf] %v477_v49  ;;  %482 = vst [vmem:[#allocation4 + $0x28] sm:$0xf] %v478_v50 }
 0x135   :  { %v533_v51 = vpop.permute.xlu1 %532 }
 0x136   :  { %v535_v52 = vsel %vm247_vm12, %v1684_v27, %v533_v51  ;;  %v494_v53 = vpop.permute.xlu0 %493 }
 0x137   :  { %539 = vst [vmem:[#allocation4 + $0x38] sm:$0xf0] %v535_v52  ;;  %v559_v17 = vld [vmem:[#allocation4] sm:$0xff] }
 0x139   :  { %v435_v54 = vpop.permute.xlu1 %434 }
 0x13a   :  { %v511_v55 = vpop.permute.xlu0 %510 }
 0x13d   :  { %v459_v56 = vpop.permute.xlu1 %458 }
 0x13e   :  { %v461_v57 = vsel %vm155_vm0, %v457_v40, %v459_v56  ;;  %v437_v58 = vpop.permute.xlu0 %436 }
 0x13f   :  { %465 = vst [vmem:[#allocation4 + $0x18] sm:$0xf0] %v461_v57  ;;  %v440_v59 = vsel %vm127_vm15, %v435_v54, %v437_v58  ;;  %v441_v60 = vsel %vm127_vm15, %v437_v58, %v439_v45 }
 0x140   :  { %444 = vst [vmem:[#allocation4 + $0x10] sm:$0xf] %v440_v59  ;;  %445 = vst [vmem:[#allocation4 + $0x18] sm:$0xf] %v441_v60 }
 0x141   :  { %v496_v13 = vpop.permute.xlu1 %495 }
 0x142   :  { %v498_v61 = vsel %vm201_vm14, %v494_v53, %v496_v13  ;;  %v455_v62 = vpop.permute.xlu0 %454 }
 0x143   :  { %502 = vst [vmem:[#allocation4 + $0x28] sm:$0xf0] %v498_v61  ;;  %v460_v63 = vsel %vm155_vm0, %v455_v62, %v457_v40  ;;  %v1722_v62 = vld [vmem:[%s1965_s5] sm:$0xff] }
 0x144   :  { %464 = vst [vmem:[#allocation4 + $0x10] sm:$0xf0] %v460_v63 }
 0x145   :  { %v492_v0 = vpop.permute.xlu1 %491 }
 0x146   :  { %v497_v1 = vsel %vm201_vm14, %v492_v0, %v494_v53  ;;  %v513_v2 = vpop.permute.xlu0 %512 }
 0x147   :  { %501 = vst [vmem:[#allocation4 + $0x20] sm:$0xf0] %v497_v1  ;;  %v516_v4 = vsel %vm228_vm2, %v511_v55, %v513_v2  ;;  %v517_v5 = vsel %vm228_vm2, %v513_v2, %v515_v47  ;;  %v562_v7 = vld [vmem:[#allocation4 + $0x18] sm:$0xff] }
 0x148   :  { %520 = vst [vmem:[#allocation4 + $0x30] sm:$0xf] %v516_v4  ;;  %521 = vst [vmem:[#allocation4 + $0x38] sm:$0xf] %v517_v5  ;;  %v1366_v8 = vpack.c.bf16 %v562_v7, %v560_v6  ;;  %v1728_v1 = vld [vmem:[%s1966_s6] sm:$0xff] }
 0x149   :  { %v529_v14 = vpop.permute.xlu1 %528 }
 0x14a   :  { %v534_v15 = vsel %vm247_vm12, %v529_v14, %v1684_v27  ;;  %1367 = vmatprep.subr.bf16.mxu1 %v1366_v8  ;;  %v550_v16 = vpop.permute.xlu0 %549  ;;  %v564_v24 = vld [vmem:[#allocation4 + $0x28] sm:$0xff] }
 0x14b   :  { %538 = vst [vmem:[#allocation4 + $0x30] sm:$0xf0] %v534_v15  ;;  %v561_v18 = vld [vmem:[#allocation4 + $0x10] sm:$0xff] }
 0x14c   :  { %v1368_v19 = vpack.c.bf16 %v561_v18, %v559_v17 }
 0x14d   :  { %v552_v20 = vpop.permute.xlu1 %551 }
 0x14e   :  { %v554_v21 = vsel %vm273_vm3, %v550_v16, %v552_v20  ;;  %1369 = vmatpush1.bf16.msra.mxu1 %v1368_v19  ;;  %v548_v22 = vpop.permute.xlu0 %547  ;;  %v563_v27 = vld [vmem:[#allocation4 + $0x20] sm:$0xff] }
 0x14f   :  { %558 = vst [vmem:[#allocation4 + $0x48] sm:$0xf] %v554_v21  ;;  %v553_v23 = vsel %vm273_vm3, %v548_v22, %v550_v16  ;;  %v566_v25 = vld [vmem:[#allocation4 + $0x38] sm:$0xff] }
 0x150   :  { %557 = vst [vmem:[#allocation4 + $0x40] sm:$0xf] %v553_v23  ;;  %v1370_v26 = vpack.c.bf16 %v566_v25, %v564_v24 }
 0x152   :  { %1371 = vmatprep.subr.bf16.mxu1 %v1370_v26  ;;  %v565_v28 = vld [vmem:[#allocation4 + $0x30] sm:$0xff] }
 0x153   :  { %v1372_v29 = vpack.c.bf16 %v565_v28, %v563_v27 }
 0x155   :  { %1373 = vmatpush1.bf16.msra.mxu1 %v1372_v29 }
 0x156   :  { %v568_v30 = vld [vmem:[#allocation4 + $0x48] sm:$0xf] }
 0x157   :  { %1351 = vmatprep.subr.msk.mxu1 %vm299_vm5, %v568_v30  ;;  %v567_v31 = vld [vmem:[#allocation4 + $0x40] sm:$0xf] }
 0x159   :  { %1352 = vmatpush1.msk.msra.mxu1 %vm299_vm5, %v567_v31  ;;  %vm696_vm5 = vcmask 1047688  }
 0x15a   :  { %1353 = vmatmul.mubr.msk.f32.vlgmr.msra.gmra.mrb[0].mxu1 %vm295_vm6, %v1691_v43 }
 0x15b   :  { %1285 = vmatprep.mubr.f32.mxu1 %v1432_v3 }
 0x15e   :  { %v293_v32 = vpop.permute.xlu1 %292 }
 0x201   :  { %v372_v33 = vpop.f32.mrb[0].mxu0 }
 0x202   :  { %v373_v34 = vadd.f32 %v372_v33, %v293_v32  ;;  %v374_v35 = vpop.f32.mrb[1].mxu0 }
 0x203   :  { %v375_v36 = vadd.f32 %v374_v35, %v293_v32 }
 0x204   :  { %v377_v37 = vmax.f32 %v373_v34, 0.0 }
 0x205   :  { %v378_v38 = vmax.f32 %v375_v36, 0.0 }
 0x206   :  { %v385_v39 = vmul.f32 %v377_v37, %v377_v37 }
 0x207   :  { %v381_v40 = vadd.f32 %v378_v38, %v377_v37  ;;  %v386_v41 = vmul.f32 %v378_v38, %v378_v38 }
 0x209   :  { %382 = vadd.xlane.f32.xlu0 %v381_v40  ;;  %v387_v44 = vadd.f32 %v386_v41, %v385_v39 }
 0x20d   :  { %388 = vadd.xlane.f32.xlu0 %v387_v44 }
 0x22d   :  { %v641_v45 = vpop.f32.mrb[0].mxu1 }
 0x22e   :  { %v642_v42 = vadd.f32 %v641_v45, %v293_v32  ;;  %v643_v46 = vpop.f32.mrb[1].mxu1 }
 0x22f   :  { %v644_v47 = vadd.f32 %v643_v46, %v293_v32 }
 0x230   :  { %v646_v43 = vmax.f32 %v642_v42, 0.0 }
 0x231   :  { %v647_v48 = vmax.f32 %v644_v47, 0.0 }
 0x232   :  { %v655_v3 = vmul.f32 %v646_v43, %v646_v43 }
 0x233   :  { %v651_v49 = vadd.f32 %v647_v48, %v646_v43  ;;  %v656_v50 = vmul.f32 %v647_v48, %v647_v48 }
 0x235   :  { %652 = vadd.xlane.f32.xlu1 %v651_v49  ;;  %v657_v51 = vadd.f32 %v656_v50, %v655_v3 }
 0x237   :  { %658 = vadd.xlane.f32.xlu0 %v657_v51 }
 0x296   :  { %v383_v52 = vpop.xlane.xlu0 %382 }
 0x29a   :  { %v389_v53 = vpop.xlane.xlu0 %388 }
 0x2c2   :  { %v653_v54 = vpop.xlane.xlu1 %652 }
 0x2c3   :  { %v654_v55 = vadd.f32 %v653_v54, %v383_v52 }
 0x2c4   :  { %v659_v56 = vpop.xlane.xlu0 %658 }
 0x2c5   :  { %v661_v57 = vmul.f32 0.001953125, %v654_v55  ;;  %v660_v58 = vadd.f32 %v659_v56, %v389_v53 }
 0x2c7   :  { %v663_v59 = vmul.f32 %v661_v57, %v661_v57  ;;  %v662_v60 = vmul.f32 0.001953125, %v660_v58 }
 0x2c9   :  { %v664_v13 = vsub.f32 %v662_v60, %v663_v59 }
 0x2cb   :  { %v665_v61 = vadd.f32 1e-05, %v664_v13 }
 0x2cd   :  { %1428 = vrsqrt.f32 %v665_v61 }
 0x2d7   :  { %v1429_v63 = vpop.eup %1428 }
 0x2d8   :  { %v667_v0 = vmul.f32 %v1429_v63, %v1722_v62 }
 0x2da   :  { %674 = vperm.xlu1 %1422, %v667_v0   ;;  %v668_v2 = vmul.f32 %v667_v0, %v661_v57 }
 0x2dc   :  { %v669_v4 = vsub.f32 %v1728_v1, %v668_v2 }
 0x2de   :  { %681 = vperm.xlu0 %1423, %v669_v4   ;;  %729 = vrot.lane.b32.xlu1 %v1516_v11, %s1435_s13 }
 0x2e2   :  { %731 = vrot.lane.b32.xlu1 %v1518_v12, %s1435_s13  ;;  %805 = vrot.lane.b32.xlu0 %v1516_v11, %s1436_s14 }
 0x2e6   :  { %758 = vrot.lane.b32.xlu1 %v1512_v9, %s1434_s7  ;;  %834 = vrot.lane.b32.xlu0 %v1512_v9, %s1437_s15 }
 0x2ea   :  { %760 = vrot.lane.b32.xlu1 %v1514_v10, %s1434_s7  ;;  %881 = vrot.lane.b32.xlu0 %v1516_v11, %s1438_s16 }
 0x2ee   :  { %807 = vrot.lane.b32.xlu1 %v1518_v12, %s1436_s14 }
 0x2f2   :  { %836 = vrot.lane.b32.xlu1 %v1514_v10, %s1437_s15 }
 0x2f6   :  { %883 = vrot.lane.b32.xlu1 %v1518_v12, %s1438_s16 }
 0x359   :  { %v675_v5 = vpop.permute.xlu1 %674 }
 0x35a   :  { %v677_v6 = vmul.f32 %v675_v5, %v377_v37  ;;  %v678_v14 = vmul.f32 %v675_v5, %v378_v38  ;;  %v1021_v16 = vmul.f32 %v675_v5, %v646_v43  ;;  %v1022_v17 = vmul.f32 %v675_v5, %v647_v48 }
 0x35d   :  { %v682_v7 = vpop.permute.xlu0 %681  ;;  %v1755_v19 = vpop.permute.xlu1 %729 }
 0x35e   :  { %v684_v8 = vadd.f32 %v682_v7, %v677_v6  ;;  %v685_v15 = vadd.f32 %v682_v7, %v678_v14  ;;  %v1023_v11 = vadd.f32 %v1021_v16, %v682_v7  ;;  %v1024_v18 = vadd.f32 %v1022_v17, %v682_v7  ;;  %v39_v16 = vld [vmem:[%s1967_s4] sm:$0xff] }
 0x360   :  { %688 = vrot.lane.b32.xlu1 %v684_v8, %s1433_s9 }
 0x361   :  { %v1757_v12 = vpop.permute.xlu1 %731  ;;  %v806_v40 = vpop.permute.xlu0 %805 }
 0x362   :  { %v733_v47 = vsel %vm112_vm8, %v1755_v19, %v1757_v12 }
 0x364   :  { %690 = vrot.lane.b32.xlu1 %v685_v15, %s1433_s9 }
 0x365   :  { %v1759_v20 = vpop.permute.xlu1 %758  ;;  %v835_v46 = vpop.permute.xlu0 %834 }
 0x368   :  { %1027 = vrot.lane.b32.xlu1 %v1023_v11, %s1433_s9 }
 0x369   :  { %v1761_v21 = vpop.permute.xlu1 %760  ;;  %v882_v49 = vpop.permute.xlu0 %881 }
 0x36a   :  { %v762_v3 = vsel %vm139_vm7, %v1759_v20, %v1761_v21 }
 0x36c   :  { %1029 = vrot.lane.b32.xlu1 %v1024_v18, %s1433_s9 }
 0x36d   :  { %v1763_v22 = vpop.permute.xlu1 %807 }
 0x36e   :  { %v809_v52 = vsel %vm185_vm9, %v806_v40, %v1763_v22 }
 0x371   :  { %v1765_v23 = vpop.permute.xlu1 %836 }
 0x372   :  { %v838_v53 = vsel %vm213_vm10, %v835_v46, %v1765_v23 }
 0x375   :  { %v1767_v24 = vpop.permute.xlu1 %883 }
 0x376   :  { %v885_v56 = vsel %vm34_vm1, %v882_v49, %v1767_v24  ;;  %vm930_vm1 = vcmask 588800  }
 0x3d2   :  { %v689_v25 = vpop.permute.xlu1 %688 }
 0x3d3   :  { %697 = vst.msk [vmem:[#allocation3] sm:$0xff] %vm696_vm5, %v689_v25 }
 0x3d6   :  { %v691_v26 = vpop.permute.xlu1 %690 }
 0x3d7   :  { %699 = vst.msk [vmem:[#allocation3 + $0x10] sm:$0xff] %vm50_vm4, %v691_v26  ;;  %v1781_v32 = vsel %vm50_vm4, %v689_v25, %v691_v26 }
 0x3d8   :  { %v738_v43 = vmul.f32 %v733_v47, %v1781_v32  ;;  %v767_v50 = vmul.f32 %v762_v3, %v1781_v32  ;;  %v814_v54 = vmul.f32 %v809_v52, %v1781_v32  ;;  %v843_v55 = vmul.f32 %v838_v53, %v1781_v32 }
 0x3d9   :  { %v890_v57 = vmul.f32 %v885_v56, %v1781_v32 }
 0x3da   :  { %v1770_v27 = vld [vmem:[#allocation3] sm:$0xff]  ;;  %v1028_v28 = vpop.permute.xlu1 %1027 }
 0x3db   :  { %714 = vrot.lane.b32.xlu0 %v1770_v27, %s1441_s19  ;;  %1035 = vst.msk [vmem:[#allocation3] sm:$0xff] %vm696_vm5, %v1028_v28  ;;  %v766_v38 = vmul.f32 %v1759_v20, %v1770_v27  ;;  %v737_v39 = vmul.f32 %v1755_v19, %v1770_v27  ;;  %v813_v42 = vmul.f32 %v806_v40, %v1770_v27 }
 0x3dc   :  { %v842_v48 = vmul.f32 %v835_v46, %v1770_v27  ;;  %v889_v51 = vmul.f32 %v882_v49, %v1770_v27 }
 0x3de   :  { %v1030_v29 = vpop.permute.xlu1 %1029  ;;  %v786_v30 = vld [vmem:[#allocation3 + $0x10] sm:$0xff] }
 0x3df   :  { %v1775_v31 = vsel %vm50_vm4, %v1028_v28, %v1030_v29  ;;  %794 = vrot.lane.b32.xlu0 %v786_v30, %s1439_s17  ;;  %718 = vrot.lane.b32.xlu1 %v786_v30, %s1441_s19  ;;  %1037 = vst.msk [vmem:[#allocation3 + $0x10] sm:$0xff] %vm50_vm4, %v1030_v29  ;;  %v739_v36 = vmul.f32 %v786_v30, %v1757_v12 }
 0x3e0   :  { %v1787_v34 = vmul.f32 %v1775_v31, %v1514_v10  ;;  %v768_v37 = vmul.f32 %v786_v30, %v1761_v21  ;;  %v815_v41 = vmul.f32 %v1763_v22, %v786_v30  ;;  %v844_v44 = vmul.f32 %v1765_v23, %v786_v30 }
 0x3e1   :  { %v891_v45 = vmul.f32 %v1767_v24, %v786_v30  ;;  %v1066_v0 = vmul.f32 %v1775_v31, %v733_v47  ;;  %v1087_v4 = vmul.f32 %v1775_v31, %v762_v3  ;;  %v1126_v6 = vmul.f32 %v1775_v31, %v809_v52 }
 0x3e2   :  { %v1783_v33 = vld [vmem:[#allocation3] sm:$0xff]  ;;  %1043 = vst [vmem:[#allocation4 + $0x8] sm:$0xff] %v1787_v34  ;;  %v1147_v8 = vmul.f32 %v1775_v31, %v838_v53  ;;  %v1186_v14 = vmul.f32 %v1775_v31, %v885_v56 }
 0x3e3   :  { %716 = vrot.lane.b32.xlu0 %v1781_v32, %s1441_s19  ;;  %790 = vrot.lane.b32.xlu1 %v1770_v27, %s1439_s17  ;;  %v1796_v35 = vmul.f32 %v1783_v33, %v1512_v9  ;;  %v1065_v60 = vmul.f32 %v1783_v33, %v1755_v19  ;;  %v1086_v63 = vmul.f32 %v1783_v33, %v1759_v20 }
 0x3e4   :  { %v1125_v5 = vmul.f32 %v1783_v33, %v806_v40  ;;  %v1146_v7 = vmul.f32 %v1783_v33, %v835_v46  ;;  %v1185_v11 = vmul.f32 %v1783_v33, %v882_v49 }
 0x3e5   :  { %1042 = vst [vmem:[#allocation4] sm:$0xff] %v1796_v35 }
 0x3e6   :  { %v1106_v58 = vld [vmem:[#allocation3 + $0x10] sm:$0xff] }
 0x3e7   :  { %868 = vrot.lane.b32.xlu0 %v1781_v32, %s1440_s18  ;;  %870 = vrot.lane.b32.xlu1 %v786_v30, %s1440_s18  ;;  %v1067_v59 = vmul.f32 %v1106_v58, %v1757_v12  ;;  %v1088_v13 = vmul.f32 %v1106_v58, %v1761_v21  ;;  %v1148_v61 = vmul.f32 %v1106_v58, %v1765_v23 }
 0x3e8   :  { %v1127_v2 = vmul.f32 %v1106_v58, %v1763_v22  ;;  %v1187_v15 = vmul.f32 %v1106_v58, %v1767_v24  ;;  %v705_v21 = vmul.f32 %v1781_v32, %v1514_v10  ;;  %v704_v22 = vmul.f32 %v1770_v27, %v1512_v9 }
 0x3eb   :  { %747 = vrot.lane.b32.xlu0 %v739_v36, %s1443_s21  ;;  %866 = vrot.lane.b32.xlu1 %v1770_v27, %s1440_s18 }
 0x3ef   :  { %776 = vrot.lane.b32.xlu0 %v768_v37, %s1444_s22  ;;  %792 = vrot.lane.b32.xlu1 %v1781_v32, %s1439_s17 }
 0x3f3   :  { %772 = vrot.lane.b32.xlu0 %v766_v38, %s1444_s22  ;;  %743 = vrot.lane.b32.xlu1 %v737_v39, %s1443_s21 }
 0x3f7   :  { %823 = vrot.lane.b32.xlu0 %v815_v41, %s1446_s24  ;;  %852 = vrot.lane.b32.xlu1 %v844_v44, %s1442_s20 }
 0x3fb   :  { %899 = vrot.lane.b32.xlu1 %v891_v45, %s1445_s23  ;;  %819 = vrot.lane.b32.xlu0 %v813_v42, %s1446_s24 }
 0x3ff   :  { %745 = vrot.lane.b32.xlu1 %v738_v43, %s1443_s21  ;;  %848 = vrot.lane.b32.xlu0 %v842_v48, %s1442_s20 }
 0x403   :  { %774 = vrot.lane.b32.xlu1 %v767_v50, %s1444_s22  ;;  %895 = vrot.lane.b32.xlu0 %v889_v51, %s1445_s23 }
 0x407   :  { %821 = vrot.lane.b32.xlu1 %v814_v54, %s1446_s24  ;;  %850 = vrot.lane.b32.xlu0 %v843_v55, %s1442_s20 }
 0x40b   :  { %1050 = vrot.lane.b32.xlu1 %v1783_v33, %s1441_s19  ;;  %897 = vrot.lane.b32.xlu0 %v890_v57, %s1445_s23 }
 0x40f   :  { %1114 = vrot.lane.b32.xlu1 %v1106_v58, %s1439_s17  ;;  %1054 = vrot.lane.b32.xlu0 %v1106_v58, %s1441_s19 }
 0x413   :  { %1052 = vrot.lane.b32.xlu1 %v1775_v31, %s1441_s19  ;;  %1110 = vrot.lane.b32.xlu0 %v1783_v33, %s1439_s17 }
 0x417   :  { %1172 = vrot.lane.b32.xlu1 %v1775_v31, %s1440_s18  ;;  %1112 = vrot.lane.b32.xlu0 %v1775_v31, %s1439_s17 }
 0x41b   :  { %1075 = vrot.lane.b32.xlu1 %v1067_v59, %s1443_s21  ;;  %1071 = vrot.lane.b32.xlu0 %v1065_v60, %s1443_s21 }
 0x41f   :  { %1096 = vrot.lane.b32.xlu1 %v1088_v13, %s1444_s22  ;;  %1156 = vrot.lane.b32.xlu0 %v1148_v61, %s1442_s20 }
 0x423   :  { %1092 = vrot.lane.b32.xlu1 %v1086_v63, %s1444_s22  ;;  %1073 = vrot.lane.b32.xlu0 %v1066_v0, %s1443_s21 }
 0x427   :  { %1135 = vrot.lane.b32.xlu1 %v1127_v2, %s1446_s24  ;;  %1094 = vrot.lane.b32.xlu0 %v1087_v4, %s1444_s22 }
 0x42b   :  { %1131 = vrot.lane.b32.xlu1 %v1125_v5, %s1446_s24  ;;  %1133 = vrot.lane.b32.xlu0 %v1126_v6, %s1446_s24  ;;  %v1922_v5 = vld [vmem:[%s1968_s3] sm:$0xff] }
 0x42f   :  { %1152 = vrot.lane.b32.xlu1 %v1146_v7, %s1442_s20  ;;  %1174 = vrot.lane.b32.xlu0 %v1106_v58, %s1440_s18 }
 0x433   :  { %1154 = vrot.lane.b32.xlu1 %v1147_v8, %s1442_s20  ;;  %1170 = vrot.lane.b32.xlu0 %v1783_v33, %s1440_s18 }
 0x437   :  { %1193 = vrot.lane.b32.xlu1 %v1186_v14, %s1445_s23  ;;  %1195 = vrot.lane.b32.xlu0 %v1187_v15, %s1445_s23 }
 0x43b   :  { %1191 = vrot.lane.b32.xlu1 %v1185_v11, %s1445_s23  ;;  %927 = vperm.xlu0 %1423, %v39_v16  }
 0x44d   :  { %v715_v17 = vpop.permute.xlu0 %714 }
 0x451   :  { %v719_v18 = vpop.permute.xlu1 %718  ;;  %v795_v19 = vpop.permute.xlu0 %794 }
 0x455   :  { %v791_v12 = vpop.permute.xlu1 %790  ;;  %v717_v20 = vpop.permute.xlu0 %716 }
 0x456   :  { %v720_v23 = vsel %vm90_vm11, %v715_v17, %v717_v20  ;;  %v721_v24 = vsel %vm90_vm11, %v717_v20, %v719_v18 }
 0x457   :  { %v1374_v25 = vpack.c.bf16 %v721_v24, %v705_v21  ;;  %v1376_v26 = vpack.c.bf16 %v720_v23, %v704_v22 }
 0x459   :  { %v871_v28 = vpop.permute.xlu1 %870  ;;  %v869_v29 = vpop.permute.xlu0 %868  ;;  %1375 = vmatprep.subr.bf16.mxu0 %v1374_v25 }
 0x45a   :  { %1377 = vmatpush1.bf16.msra.mxu0 %v1376_v26  ;;  %v873_v57 = vsel %vm247_vm12, %v869_v29, %v871_v28 }
 0x45d   :  { %v867_v30 = vpop.permute.xlu1 %866  ;;  %v748_v31 = vpop.permute.xlu0 %747 }
 0x45e   :  { %v872_v61 = vsel %vm247_vm12, %v867_v30, %v869_v29 }
 0x461   :  { %v793_v33 = vpop.permute.xlu1 %792  ;;  %v777_v36 = vpop.permute.xlu0 %776 }
 0x462   :  { %v796_v3 = vsel %vm173_vm13, %v791_v12, %v793_v33  ;;  %v797_v51 = vsel %vm173_vm13, %v793_v33, %v795_v19 }
 0x465   :  { %v744_v37 = vpop.permute.xlu1 %743  ;;  %v773_v38 = vpop.permute.xlu0 %772 }
 0x469   :  { %v853_v10 = vpop.permute.xlu1 %852  ;;  %v824_v32 = vpop.permute.xlu0 %823 }
 0x46d   :  { %v900_v39 = vpop.permute.xlu1 %899  ;;  %v820_v9 = vpop.permute.xlu0 %819 }
 0x471   :  { %v746_v27 = vpop.permute.xlu1 %745  ;;  %v849_v40 = vpop.permute.xlu0 %848 }
 0x472   :  { %v749_v45 = vsel %vm127_vm15, %v744_v37, %v746_v27  ;;  %v750_v42 = vsel %vm127_vm15, %v746_v27, %v748_v31 }
 0x475   :  { %v775_v41 = vpop.permute.xlu1 %774  ;;  %v896_v44 = vpop.permute.xlu0 %895 }
 0x476   :  { %v778_v46 = vsel %vm155_vm0, %v773_v38, %v775_v41  ;;  %v779_v47 = vsel %vm155_vm0, %v775_v41, %v777_v36 }
 0x477   :  { %v1378_v43 = vpack.c.bf16 %v779_v47, %v750_v42  ;;  %v1380_v48 = vpack.c.bf16 %v778_v46, %v749_v45 }
 0x479   :  { %v822_v49 = vpop.permute.xlu1 %821  ;;  %v851_v50 = vpop.permute.xlu0 %850  ;;  %1379 = vmatprep.subr.bf16.mxu0 %v1378_v43 }
 0x47a   :  { %v825_v52 = vsel %vm201_vm14, %v820_v9, %v822_v49  ;;  %v826_v53 = vsel %vm201_vm14, %v822_v49, %v824_v32  ;;  %v855_v54 = vsel %vm228_vm2, %v851_v50, %v853_v10  ;;  %1381 = vmatpush1.bf16.msra.mxu0 %v1380_v48  ;;  %v854_v58 = vsel %vm228_vm2, %v849_v40, %v851_v50 }
 0x47b   :  { %v1382_v55 = vpack.c.bf16 %v826_v53, %v797_v51  ;;  %v1384_v56 = vpack.c.bf16 %v825_v52, %v796_v3  ;;  %v1386_v13 = vpack.c.bf16 %v873_v57, %v855_v54  ;;  %v1388_v63 = vpack.c.bf16 %v872_v61, %v854_v58 }
 0x47d   :  { %v1051_v59 = vpop.permute.xlu1 %1050  ;;  %v898_v60 = vpop.permute.xlu0 %897  ;;  %1383 = vmatprep.subr.bf16.mxu0 %v1382_v55 }
 0x47e   :  { %1385 = vmatpush1.bf16.msra.mxu0 %v1384_v56  ;;  %v902_v4 = vsel %vm273_vm3, %v898_v60, %v900_v39  ;;  %v901_v6 = vsel %vm273_vm3, %v896_v44, %v898_v60 }
 0x47f   :  { %1387 = vmatprep.subr.bf16.mxu0 %v1386_v13 }
 0x481   :  { %v1115_v0 = vpop.permute.xlu1 %1114  ;;  %v1055_v2 = vpop.permute.xlu0 %1054 }
 0x482   :  { %1389 = vmatpush1.bf16.msra.mxu0 %v1388_v63 }
 0x483   :  { %950 = vmatprep.subr.mxu0 %v902_v4 }
 0x485   :  { %v1053_v7 = vpop.permute.xlu1 %1052  ;;  %v1111_v8 = vpop.permute.xlu0 %1110 }
 0x486   :  { %v1056_v14 = vsel %vm90_vm11, %v1051_v59, %v1053_v7  ;;  %v1057_v15 = vsel %vm90_vm11, %v1053_v7, %v1055_v2  ;;  %951 = vmatpush1.msra.mxu0 %v901_v6 }
 0x487   :  { %1060 = vst [vmem:[#allocation4 + $0x10] sm:$0xff] %v1056_v14  ;;  %1061 = vst [vmem:[#allocation4 + $0x18] sm:$0xff] %v1057_v15  ;;  %1354 = vmatmul.mubr.msk.f32.vlgmr.msra.gmra.mrb[2].mxu0 %vm930_vm1, %v1922_v5  ;;  %v1390_v16 = vpack.c.bf16 %v1057_v15, %v1787_v34  ;;  %v1392_v11 = vpack.c.bf16 %v1056_v14, %v1796_v35 }
 0x489   :  { %v1173_v17 = vpop.permute.xlu1 %1172  ;;  %v1113_v18 = vpop.permute.xlu0 %1112  ;;  %1391 = vmatprep.subr.bf16.mxu1 %v1390_v16 }
 0x48a   :  { %v1116_v19 = vsel %vm173_vm13, %v1111_v8, %v1113_v18  ;;  %v1117_v12 = vsel %vm173_vm13, %v1113_v18, %v1115_v0  ;;  %1393 = vmatpush1.bf16.msra.mxu1 %v1392_v11 }
 0x48b   :  { %1120 = vst [vmem:[#allocation4 + $0x40] sm:$0xff] %v1116_v19  ;;  %1121 = vst [vmem:[#allocation4 + $0x48] sm:$0xff] %v1117_v12 }
 0x48d   :  { %v1076_v20 = vpop.permute.xlu1 %1075  ;;  %v1072_v21 = vpop.permute.xlu0 %1071 }
 0x491   :  { %v1097_v22 = vpop.permute.xlu1 %1096  ;;  %v1157_v23 = vpop.permute.xlu0 %1156 }
 0x495   :  { %v1093_v24 = vpop.permute.xlu1 %1092  ;;  %v1074_v25 = vpop.permute.xlu0 %1073 }
 0x496   :  { %v1077_v34 = vsel %vm127_vm15, %v1072_v21, %v1074_v25  ;;  %v1078_v35 = vsel %vm127_vm15, %v1074_v25, %v1076_v20 }
 0x497   :  { %1081 = vst [vmem:[#allocation4 + $0x20] sm:$0xff] %v1077_v34  ;;  %1082 = vst [vmem:[#allocation4 + $0x28] sm:$0xff] %v1078_v35 }
 0x499   :  { %v1136_v26 = vpop.permute.xlu1 %1135  ;;  %v1095_v28 = vpop.permute.xlu0 %1094 }
 0x49a   :  { %v1098_v29 = vsel %vm155_vm0, %v1093_v24, %v1095_v28  ;;  %v1099_v30 = vsel %vm155_vm0, %v1095_v28, %v1097_v22 }
 0x49b   :  { %1102 = vst [vmem:[#allocation4 + $0x30] sm:$0xff] %v1098_v29  ;;  %1103 = vst [vmem:[#allocation4 + $0x38] sm:$0xff] %v1099_v30  ;;  %v1394_v31 = vpack.c.bf16 %v1099_v30, %v1078_v35  ;;  %v1396_v33 = vpack.c.bf16 %v1098_v29, %v1077_v34 }
 0x49d   :  { %v1132_v36 = vpop.permute.xlu1 %1131  ;;  %v1134_v37 = vpop.permute.xlu0 %1133  ;;  %1395 = vmatprep.subr.bf16.mxu1 %v1394_v31 }
 0x49e   :  { %v1137_v38 = vsel %vm201_vm14, %v1132_v36, %v1134_v37  ;;  %v1138_v10 = vsel %vm201_vm14, %v1134_v37, %v1136_v26  ;;  %1397 = vmatpush1.bf16.msra.mxu1 %v1396_v33 }
 0x49f   :  { %v1398_v32 = vpack.c.bf16 %v1138_v10, %v1117_v12  ;;  %v1400_v39 = vpack.c.bf16 %v1137_v38, %v1116_v19 }
 0x4a1   :  { %v1153_v9 = vpop.permute.xlu1 %1152  ;;  %v1175_v27 = vpop.permute.xlu0 %1174  ;;  %1399 = vmatprep.subr.bf16.mxu1 %v1398_v32 }
 0x4a2   :  { %v1177_v40 = vsel %vm247_vm12, %v1173_v17, %v1175_v27  ;;  %1401 = vmatpush1.bf16.msra.mxu1 %v1400_v39 }
 0x4a5   :  { %v1155_v41 = vpop.permute.xlu1 %1154  ;;  %v1171_v44 = vpop.permute.xlu0 %1170 }
 0x4a6   :  { %v1158_v45 = vsel %vm228_vm2, %v1153_v9, %v1155_v41  ;;  %v1159_v42 = vsel %vm228_vm2, %v1155_v41, %v1157_v23  ;;  %v1176_v46 = vsel %vm247_vm12, %v1171_v44, %v1173_v17 }
 0x4a7   :  { %v1402_v47 = vpack.c.bf16 %v1177_v40, %v1159_v42  ;;  %v1404_v43 = vpack.c.bf16 %v1176_v46, %v1158_v45 }
 0x4a9   :  { %v1194_v48 = vpop.permute.xlu1 %1193  ;;  %v1196_v3 = vpop.permute.xlu0 %1195  ;;  %1403 = vmatprep.subr.bf16.mxu1 %v1402_v47 }
 0x4aa   :  { %v1198_v49 = vsel %vm273_vm3, %v1194_v48, %v1196_v3  ;;  %1405 = vmatpush1.bf16.msra.mxu1 %v1404_v43 }
 0x4ab   :  { %1237 = vmatprep.subr.mxu1 %v1198_v49 }
 0x4ad   :  { %v1192_v50 = vpop.permute.xlu1 %1191 }
 0x4ae   :  { %v1197_v51 = vsel %vm273_vm3, %v1192_v50, %v1194_v48 }
 0x4af   :  { %1238 = vmatpush1.msra.mxu1 %v1197_v51 }
 0x4b0   :  { %1355 = vmatmul.mubr.msk.f32.vlgmr.msra.gmra.mrb[2].mxu1 %vm930_vm1, %v1922_v5 }
 0x4ba   :  { %v928_v52 = vpop.permute.xlu0 %927 }
 0x55a   :  { %v1000_v53 = vpop.f32.mrb[2].mxu0 }
 0x55b   :  { %v1001_v54 = vadd.f32 %v1000_v53, %v928_v52  ;;  %v1002_v55 = vpop.f32.mrb[3].mxu0 }
 0x55c   :  { %v1003_v56 = vadd.f32 %v1002_v55, %v928_v52 }
 0x55d   :  { %v1005_v57 = vmax.f32 %v1001_v54, 0.0 }
 0x55e   :  { %v1006_v58 = vmax.f32 %v1003_v56, 0.0 }
 0x55f   :  { %v1013_v6 = vmul.f32 %v1005_v57, %v1005_v57 }
 0x560   :  { %v1009_v59 = vadd.f32 %v1006_v58, %v1005_v57  ;;  %v1014_v7 = vmul.f32 %v1006_v58, %v1006_v58 }
 0x562   :  { %1010 = vadd.xlane.f32.xlu1 %v1009_v59  ;;  %v1015_v15 = vadd.f32 %v1014_v7, %v1013_v6 }
 0x583   :  { %v1287_v60 = vpop.f32.mrb[2].mxu1 }
 0x584   :  { %v1288_v13 = vadd.f32 %v1287_v60, %v928_v52  ;;  %v1289_v61 = vpop.f32.mrb[3].mxu1 }
 0x585   :  { %v1290_v63 = vadd.f32 %v1289_v61, %v928_v52 }
 0x586   :  { %v1292_v0 = vmax.f32 %v1288_v13, 0.0 }
 0x587   :  { %v1293_v2 = vmax.f32 %v1290_v63, 0.0 }
 0x588   :  { %v1300_v4 = vmul.f32 %v1292_v0, %v1292_v0 }
 0x589   :  { %v1301_v8 = vmul.f32 %v1293_v2, %v1293_v2  ;;  %v1296_v5 = vadd.f32 %v1293_v2, %v1292_v0 }
 0x58b   :  { %1297 = vadd.xlane.f32.xlu0 %v1296_v5  ;;  %v1302_v14 = vadd.f32 %v1301_v8, %v1300_v4 }
 0x58d   :  { %1303 = vadd.xlane.f32.xlu1 %v1302_v14 }
 0x58f   :  { %1016 = vadd.xlane.f32.xlu0 %v1015_v15 }
 0x5ef   :  { %v1011_v16 = vpop.xlane.xlu1 %1010 }
 0x618   :  { %v1298_v11 = vpop.xlane.xlu0 %1297 }
 0x619   :  { %v1299_v17 = vadd.f32 %v1298_v11, %v1011_v16 }
 0x61a   :  { %v1304_v19 = vpop.xlane.xlu1 %1303 }
 0x61b   :  { %v1306_v18 = vmul.f32 0.001953125, %v1299_v17 }
 0x61c   :  { %v1017_v12 = vpop.xlane.xlu0 %1016 }
 0x61d   :  { %v1305_v20 = vadd.f32 %v1304_v19, %v1017_v12  ;;  %v1308_v21 = vmul.f32 %v1306_v18, %v1306_v18 }
 0x61f   :  { %v1307_v22 = vmul.f32 0.001953125, %v1305_v20 }
 0x621   :  { %v1309_v23 = vsub.f32 %v1307_v22, %v1308_v21 }
 0x623   :  { %v1310_v24 = vadd.f32 1e-05, %v1309_v23 }
 0x625   :  { %1430 = vrsqrt.f32 %v1310_v24 }
 0x62f   :  { %v1431_v25 = vpop.eup %1430 }
 0x630   :  { %v1312_v34 = vmul.f32 %v1431_v25, %v1722_v62 }
 0x632   :  { %1319 = vperm.xlu0 %1423, %v1312_v34   ;;  %v1313_v35 = vmul.f32 %v1312_v34, %v1306_v18 }
 0x634   :  { %v1314_v26 = vsub.f32 %v1728_v1, %v1313_v35 }
 0x636   :  { %1326 = vperm.xlu1 %1422, %v1314_v26  }
 0x6b1   :  { %v1320_v28 = vpop.permute.xlu0 %1319 }
 0x6b2   :  { %v1322_v29 = vmul.f32 %v1320_v28, %v1005_v57  ;;  %v1323_v30 = vmul.f32 %v1320_v28, %v1006_v58  ;;  %v1335_v31 = vmul.f32 %v1320_v28, %v1292_v0  ;;  %v1336_v33 = vmul.f32 %v1320_v28, %v1293_v2 }
 0x6b5   :  { %v1327_v36 = vpop.permute.xlu1 %1326 }
 0x6b6   :  { %v1329_v37 = vadd.f32 %v1327_v36, %v1322_v29  ;;  %v1330_v38 = vadd.f32 %v1327_v36, %v1323_v30  ;;  %v1337_v10 = vadd.f32 %v1335_v31, %v1327_v36  ;;  %v1338_v32 = vadd.f32 %v1336_v33, %v1327_v36 }
 0x6b8   :  { %1331 = vst [vmem:[%s1969_s8] sm:$0xff] %v1329_v37  ;;  %1332 = vst [vmem:[%s1969_s8 + $0x8] sm:$0xff] %v1330_v38 }
 0x6b9   :  { %1356 = vst [vmem:[%s1969_s8 + $0x10] sm:$0xff] %v1337_v10  ;;  %1357 = vst [vmem:[%s1969_s8 + $0x18] sm:$0xff] %v1338_v32 }

</bundles_post_ra>
